<compile_context>
chip_gen: v6e
topology: v6e:2x2x1
jax: 0.10.0
libtpu: 0.0.40
codegen_flags: <defaults>
</compile_context>

<pallas_src>
import jax
import jax.numpy as jnp
from jax import lax
from jax.experimental import pallas as pl
from jax.experimental.pallas import tpu as pltpu

_BF16 = jnp.bfloat16
_F32 = jnp.float32
_POOLS = (5, 9, 13)

_PAR = pltpu.CompilerParams(dimension_semantics=("parallel",))
_PAR_IMG = pltpu.CompilerParams(dimension_semantics=("parallel",),
                                vmem_limit_bytes=64 * 1024 * 1024)


# ----------------------------------------------------------------------------
# helpers
# ----------------------------------------------------------------------------
def _mish(x):
    """In-kernel Mish (f32 math): x*tanh(softplus(x)) with
    tanh(softplus(x)) = u(u+2)/(u(u+2)+2), u = e^x  ->  1 exp + 1 approx recip."""
    u = jnp.exp(jnp.minimum(x, 20.0))          # ratio == 1.0 beyond ~20 anyway
    t = u * (u + 2.0)
    return x * t * pl.reciprocal(t + 2.0, approx=True)


def _mish_ref(x):
    sp = jnp.maximum(x, 0.0) + jnp.log1p(jnp.exp(-jnp.abs(x)))
    return x * jnp.tanh(sp)


def _pad_hw(x, ph, pw, value):
    """Constant-pad a (H, W, C) value inside the kernel (no HBM round trip).
    W-pads used here are multiples of 8 so the sublane-dim concat stays aligned."""
    h, w, c = x.shape
    if pw:
        wp = jnp.full((h, pw, c), value, x.dtype)
        x = jnp.concatenate([wp, x, wp], axis=1)
    if ph:
        hp = jnp.full((ph, x.shape[1], c), value, x.dtype)
        x = jnp.concatenate([hp, x, hp], axis=0)
    return x


def _tile_m(m, target=1024):
    return m if m <= target else target


# ----------------------------------------------------------------------------
# Kernel 1: fused cv1 (1x1 conv + BN + Mish) and cv2 (plain 1x1 conv).
#   One read of the input activation feeds both MXU matmuls.
# ----------------------------------------------------------------------------
def _cv1_cv2_kernel(x_ref, w1_ref, s1_ref, b1_ref, w2_ref, o1_ref, o2_ref):
    x = x_ref[...]
    a1 = jnp.dot(x, w1_ref[...], preferred_element_type=jnp.float32)
    o1_ref[...] = _mish(a1 * s1_ref[...] + b1_ref[...]).astype(o1_ref.dtype)
    a2 = jnp.dot(x, w2_ref[...], preferred_element_type=jnp.float32)
    o2_ref[...] = a2.astype(o2_ref.dtype)


def cv1_cv2(xf, w1, s1, b1, w2):
    m, c1 = xf.shape
    c_ = w1.shape[1]
    tm = _tile_m(m)
    return pl.pallas_call(
        _cv1_cv2_kernel,
        out_shape=(jax.ShapeDtypeStruct((m, c_), _BF16),
                   jax.ShapeDtypeStruct((m, c_), _BF16)),
        grid=(pl.cdiv(m, tm),),
        in_specs=[
            pl.BlockSpec((tm, c1), lambda i: (i, 0)),
            pl.BlockSpec((c1, c_), lambda i: (0, 0)),
            pl.BlockSpec((1, c_), lambda i: (0, 0)),
            pl.BlockSpec((1, c_), lambda i: (0, 0)),
            pl.BlockSpec((c1, c_), lambda i: (0, 0)),
        ],
        out_specs=(pl.BlockSpec((tm, c_), lambda i: (i, 0)),
                   pl.BlockSpec((tm, c_), lambda i: (i, 0))),
        compiler_params=_PAR,
    )(xf, w1, s1.reshape(1, c_), b1.reshape(1, c_), w2)


# ----------------------------------------------------------------------------
# Kernel 2: 1x1 conv + folded BN + Mish (used for cv4), tiled over M.
# ----------------------------------------------------------------------------
def _pw_kernel(x_ref, w_ref, s_ref, b_ref, o_ref):
    acc = jnp.dot(x_ref[...], w_ref[...], preferred_element_type=jnp.float32)
    o_ref[...] = _mish(acc * s_ref[...] + b_ref[...]).astype(o_ref.dtype)


def pw_conv(x, w, scale, bias):
    m, cin = x.shape
    cout = w.shape[1]
    tm = _tile_m(m)
    return pl.pallas_call(
        _pw_kernel,
        out_shape=jax.ShapeDtypeStruct((m, cout), _BF16),
        grid=(pl.cdiv(m, tm),),
        in_specs=[
            pl.BlockSpec((tm, cin), lambda i: (i, 0)),
            pl.BlockSpec((cin, cout), lambda i: (0, 0)),
            pl.BlockSpec((1, cout), lambda i: (0, 0)),
            pl.BlockSpec((1, cout), lambda i: (0, 0)),
        ],
        out_specs=pl.BlockSpec((tm, cout), lambda i: (i, 0)),
        compiler_params=_PAR,
    )(x, w, scale.reshape(1, cout), bias.reshape(1, cout))


# ----------------------------------------------------------------------------
# Kernel 3: 3x3 conv (pad 1, stride 1) + folded BN + Mish, gridded over batch.
#   Zero pad built in VMEM; 9 shifted bf16 MXU matmuls accumulated in f32.
# ----------------------------------------------------------------------------
def _conv3x3_kernel(x_ref, w_ref, s_ref, b_ref, o_ref):
    _, h, w, c = x_ref.shape
    cout = o_ref.shape[-1]
    # Pad in VMEM: H by 1 (outer-dim concat), W by 8 (aligned sublane concat, >=1 needed).
    xp = _pad_hw(x_ref[0].astype(jnp.float32), 1, 8, 0.0)       # (H+2, W+16, C)
    acc = jnp.zeros((h * w, cout), jnp.float32)
    for dx in range(3):
        # One shifted-slice relayout per dx (3 instead of 9); dy taps are
        # sublane-aligned row views of the flattened strip (W multiple of 8).
        xs = xp[:, dx + 7:dx + 7 + w, :].reshape((h + 2) * w, c).astype(_BF16)
        for dy in range(3):
            rows = xs[dy * w:dy * w + h * w, :]
            acc = acc + jnp.dot(rows, w_ref[dy, dx],
                                preferred_element_type=jnp.float32)
    y = _mish(acc * s_ref[...] + b_ref[...])
    o_ref[0] = y.reshape(h, w, cout).astype(o_ref.dtype)


def conv3x3(x, w, scale, bias):
    n, h, width, cin = x.shape
    cout = w.shape[-1]
    # TODO(synk): H-strip tiling with a 1-row halo for very large feature maps (v7x VMEM).
    return pl.pallas_call(
        _conv3x3_kernel,
        out_shape=jax.ShapeDtypeStruct((n, h, width, cout), _BF16),
        grid=(n,),
        in_specs=[
            pl.BlockSpec((1, h, width, cin), lambda i: (i, 0, 0, 0)),
            pl.BlockSpec((3, 3, cin, cout), lambda i: (0, 0, 0, 0)),
            pl.BlockSpec((1, cout), lambda i: (0, 0)),
            pl.BlockSpec((1, cout), lambda i: (0, 0)),
        ],
        out_specs=pl.BlockSpec((1, h, width, cout), lambda i: (i, 0, 0, 0)),
        compiler_params=_PAR_IMG,
    )(x, w, scale.reshape(1, cout), bias.reshape(1, cout))


# ----------------------------------------------------------------------------
# Kernel 4: fused SPP (maxpool k=5,9,13, stride 1, "same") + concat + cv5
#   (1x1 conv + BN + Mish).  Concat is folded into cv5 via a split-K MXU
#   accumulation; pools are separable, cascaded and dyadic (never hit HBM).
# ----------------------------------------------------------------------------
def _spp_cv5_kernel(x_ref, w_ref, s_ref, b_ref, o_ref):
    _, h, w, c = x_ref.shape
    cout = o_ref.shape[-1]
    x = x_ref[0]                                        # (H, W, C) bf16
    xf = x.astype(jnp.float32)
    neg = -jnp.inf

    # W padded by 8 on each side (>= 6 needed; multiple of 8 keeps the concat aligned).
    xw = _pad_hw(xf, 0, 8, neg)                         # (H, W+16, C)

    def hmax(t, s):                                     # t[:, j] -> max(t[:, j], t[:, j+s])
        return jnp.maximum(t[:, :t.shape[1] - s, :], t[:, s:, :])

    hm5 = hmax(hmax(hmax(xw, 1), 2), 1)                 # horizontal window 5
    hm9 = hmax(hm5, 4)                                  # window 9 reuses window 5
    hm13 = hmax(hm9, 4)                                 # window 13 reuses window 9
    hm = {5: hm5, 9: hm9, 13: hm13}

    def vreduce(t, k):                                  # dyadic vertical window-k max
        cov = 1
        while cov < k:
            s = min(cov, k - cov)
            t = jnp.maximum(t[:t.shape[0] - s], t[s:])
            cov += s
        return t

    branches = [x]                                      # identity branch
    for k in _POOLS:
        off = 8 - k // 2
        hk = hm[k][:, off:off + w, :]                   # (H, W, C)
        hk = _pad_hw(hk, k // 2, 0, neg)                # (H+k-1, W, C)  (outer-dim concat)
        branches.append(vreduce(hk, k).astype(_BF16))   # (H, W, C)

    # concat folded into cv5: one K-chunk of the weight per branch.
    acc = jnp.zeros((h * w, cout), jnp.float32)
    for i, br in enumerate(branches):
        acc = acc + jnp.dot(br.reshape(h * w, c), w_ref[i * c:(i + 1) * c, :],
                            preferred_element_type=jnp.float32)
    y = _mish(acc * s_ref[...] + b_ref[...])
    o_ref[0] = y.reshape(h, w, cout).astype(o_ref.dtype)


def spp_cv5(x1, w5, scale, bias):
    n, h, width, c = x1.shape
    cout = w5.shape[1]
    assert w5.shape[0] == (1 + len(_POOLS)) * c
    # TODO(synk): H-strip tiling with a max(k)//2 halo for very large feature maps (v7x VMEM).
    return pl.pallas_call(
        _spp_cv5_kernel,
        out_shape=jax.ShapeDtypeStruct((n, h, width, cout), _BF16),
        grid=(n,),
        in_specs=[
            pl.BlockSpec((1, h, width, c), lambda i: (i, 0, 0, 0)),
            pl.BlockSpec(((1 + len(_POOLS)) * c, cout), lambda i: (0, 0)),
            pl.BlockSpec((1, cout), lambda i: (0, 0)),
            pl.BlockSpec((1, cout), lambda i: (0, 0)),
        ],
        out_specs=pl.BlockSpec((1, h, width, cout), lambda i: (i, 0, 0, 0)),
        compiler_params=_PAR_IMG,
    )(x1, w5, scale.reshape(1, cout), bias.reshape(1, cout))


# ----------------------------------------------------------------------------
# Kernel 5: fused CSP head: concat(y1, y2) -> BN -> Mish -> cv7 (1x1 conv+BN+Mish).
#   The concat is folded away: BN/Mish per half, cv7 weight split into two chunks.
# ----------------------------------------------------------------------------
def _csp_head_kernel(y1_ref, y2_ref, s1_ref, b1_ref, s2_ref, b2_ref,
                     w_ref, s7_ref, b7_ref, o_ref):
    c = y1_ref.shape[-1]
    a1 = _mish(y1_ref[...].astype(jnp.float32) * s1_ref[...] + b1_ref[...])
    a2 = _mish(y2_ref[...].astype(jnp.float32) * s2_ref[...] + b2_ref[...])
    acc = jnp.dot(a1.astype(_BF16), w_ref[0:c, :],
                  preferred_element_type=jnp.float32)
    acc = acc + jnp.dot(a2.astype(_BF16), w_ref[c:2 * c, :],
                        preferred_element_type=jnp.float32)
    o_ref[...] = _mish(acc * s7_ref[...] + b7_ref[...]).astype(o_ref.dtype)


def csp_head(y1, y2, bn_s, bn_b, w7, s7, b7):
    m, c = y1.shape
    c2 = w7.shape[1]
    tm = _tile_m(m)
    return pl.pallas_call(
        _csp_head_kernel,
        out_shape=jax.ShapeDtypeStruct((m, c2), _F32),
        grid=(pl.cdiv(m, tm),),
        in_specs=[
            pl.BlockSpec((tm, c), lambda i: (i, 0)),
            pl.BlockSpec((tm, c), lambda i: (i, 0)),
            pl.BlockSpec((1, c), lambda i: (0, 0)),
            pl.BlockSpec((1, c), lambda i: (0, 0)),
            pl.BlockSpec((1, c), lambda i: (0, 0)),
            pl.BlockSpec((1, c), lambda i: (0, 0)),
            pl.BlockSpec((2 * c, c2), lambda i: (0, 0)),
            pl.BlockSpec((1, c2), lambda i: (0, 0)),
            pl.BlockSpec((1, c2), lambda i: (0, 0)),
        ],
        out_specs=pl.BlockSpec((tm, c2), lambda i: (i, 0)),
        compiler_params=_PAR,
    )(y1, y2,
      bn_s[:c].reshape(1, c), bn_b[:c].reshape(1, c),
      bn_s[c:].reshape(1, c), bn_b[c:].reshape(1, c),
      w7, s7.reshape(1, c2), b7.reshape(1, c2))


# ----------------------------------------------------------------------------
# SPPCSP forward (Pallas) — input/output in NCHW to match PyTorch.
# ----------------------------------------------------------------------------
def sppcsp_forward(x_nchw, p):
    x = jnp.transpose(x_nchw, (0, 2, 3, 1)).astype(_BF16)     # NHWC, bf16
    n, h, w, c1 = x.shape
    m = n * h * w
    c_ = p["c_"]
    c2 = p["c2"]
    wb = {k: p[k].astype(_BF16)
          for k in ("w1", "w2", "w3", "w4", "w5", "w6", "w7")}
    xf = x.reshape(m, c1)

    # x1 = cv4(cv3(cv1(x)));  y2 = cv2(x)  (cv1 & cv2 fused, x read once)
    t, y2 = cv1_cv2(xf, wb["w1"], p["s1"], p["b1"], wb["w2"])
    t = conv3x3(t.reshape(n, h, w, c_), wb["w3"], p["s3"], p["b3"])
    x1 = pw_conv(t.reshape(m, c_), wb["w4"], p["s4"], p["b4"])

    # y1 = cv6(cv5(cat[x1, max5, max9, max13]))  (pools + concat fused into cv5)
    y = spp_cv5(x1.reshape(n, h, w, c_), wb["w5"], p["s5"], p["b5"])
    y1 = conv3x3(y, wb["w6"], p["s6"], p["b6"]).reshape(m, c_)

    # out = cv7(mish(bn(cat[y1, y2])))  (concat fused into cv7)
    out = csp_head(y1, y2, p["bn_s"], p["bn_b"], wb["w7"], p["s7"], p["b7"])
    return jnp.transpose(out.reshape(n, h, w, c2), (0, 3, 1, 2))


# ----------------------------------------------------------------------------
# Pure-JAX reference (XLA ops) mirroring the kernel's bf16 storage points.
# ----------------------------------------------------------------------------
def sppcsp_reference(x_nchw, p):
    x = jnp.transpose(x_nchw, (0, 2, 3, 1)).astype(_BF16)

    def conv1x1(v, w):
        return jnp.einsum("nhwc,co->nhwo", v.astype(_BF16), w.astype(_BF16),
                          preferred_element_type=_F32)

    def conv3(v, w):
        return lax.conv_general_dilated(
            v.astype(_BF16), w.astype(_BF16), (1, 1), "SAME",
            dimension_numbers=("NHWC", "HWIO", "NHWC"),
            preferred_element_type=_F32)

    def bn_mish(v, s, b):
        return _mish_ref(v * s + b)

    def maxpool(v, k):
        q = k // 2
        return lax.reduce_window(v, -jnp.inf, lax.max, (1, k, k, 1),
                                 (1, 1, 1, 1),
                                 [(0, 0), (q, q), (q, q), (0, 0)])

    t = bn_mish(conv1x1(x, p["w1"]), p["s1"], p["b1"]).astype(_BF16)
    t = bn_mish(conv3(t, p["w3"]), p["s3"], p["b3"]).astype(_BF16)
    x1 = bn_mish(conv1x1(t, p["w4"]), p["s4"], p["b4"]).astype(_BF16)
    x1f = x1.astype(_F32)
    cat1 = jnp.concatenate(
        [x1f, maxpool(x1f, 5), maxpool(x1f, 9), maxpool(x1f, 13)], axis=-1)
    y = bn_mish(conv1x1(cat1, p["w5"]), p["s5"], p["b5"]).astype(_BF16)
    y1 = bn_mish(conv3(y, p["w6"]), p["s6"], p["b6"]).astype(_BF16)
    y2 = conv1x1(x, p["w2"]).astype(_BF16)
    cat2 = jnp.concatenate([y1, y2], axis=-1).astype(_F32)
    z = _mish_ref(cat2 * p["bn_s"] + p["bn_b"])
    out = bn_mish(conv1x1(z, p["w7"]), p["s7"], p["b7"])
    return jnp.transpose(out, (0, 3, 1, 2))


# ----------------------------------------------------------------------------
# Parameter construction (deterministic, folded inference BatchNorm).
# ----------------------------------------------------------------------------
def make_params(key, c1, c2, e=0.5):
    c_ = int(2 * c2 * e)
    keys = iter(jax.random.split(key, 48))

    def conv_w(cin, cout, k):
        w = jax.random.normal(next(keys), (k, k, cin, cout), jnp.float32)
        return w / jnp.sqrt(jnp.float32(cin * k * k))

    def bn(c):
        gamma = 1.0 + 0.2 * jax.random.normal(next(keys), (c,), jnp.float32)
        beta = 0.1 * jax.random.normal(next(keys), (c,), jnp.float32)
        mean = 0.1 * jax.random.normal(next(keys), (c,), jnp.float32)
        var = 0.5 + jax.random.uniform(next(keys), (c,), jnp.float32)
        s = gamma / jnp.sqrt(var + 1e-5)
        return s, beta - mean * s

    p = {"c_": c_, "c2": c2}
    p["w1"] = conv_w(c1, c_, 1).reshape(c1, c_)
    p["s1"], p["b1"] = bn(c_)
    p["w2"] = conv_w(c1, c_, 1).reshape(c1, c_)
    p["w3"] = conv_w(c_, c_, 3)
    p["s3"], p["b3"] = bn(c_)
    p["w4"] = conv_w(c_, c_, 1).reshape(c_, c_)
    p["s4"], p["b4"] = bn(c_)
    p["w5"] = conv_w(4 * c_, c_, 1).reshape(4 * c_, c_)
    p["s5"], p["b5"] = bn(c_)
    p["w6"] = conv_w(c_, c_, 3)
    p["s6"], p["b6"] = bn(c_)
    p["bn_s"], p["bn_b"] = bn(2 * c_)
    p["w7"] = conv_w(2 * c_, c2, 1).reshape(2 * c_, c2)
    p["s7"], p["b7"] = bn(c2)
    return p


if __name__ == "__main__":
    key = jax.random.PRNGKey(0)
    kx, kp = jax.random.split(key)

    N, C1, C2, H, W = 2, 16, 16, 16, 16
    x = jax.random.normal(kx, (N, C1, H, W), dtype=jnp.float32)
    params = make_params(kp, C1, C2)

    out = jax.block_until_ready(sppcsp_forward(x, params))
    ref = jax.block_until_ready(sppcsp_reference(x, params))

    assert out.shape == ref.shape == (N, C2, H, W), (out.shape, ref.shape)
    max_err = float(jnp.max(jnp.abs(out - ref)))
    assert jnp.allclose(out, ref, rtol=5e-2, atol=5e-2), max_err

    print("KERNEL_OK")
</pallas_src>

<mosaic_0001>
module attributes {stable_mosaic.version = 11 : i64} {
  func.func @_cv1_cv2_kernel(%arg0: i32, %arg1: memref<512x16xbf16, #tpu.memory_space<vmem>>, %arg2: memref<16x16xbf16, #tpu.memory_space<vmem>>, %arg3: memref<1x16xf32, #tpu.memory_space<vmem>>, %arg4: memref<1x16xf32, #tpu.memory_space<vmem>>, %arg5: memref<16x16xbf16, #tpu.memory_space<vmem>>, %arg6: memref<512x16xbf16, #tpu.memory_space<vmem>>, %arg7: memref<512x16xbf16, #tpu.memory_space<vmem>>) attributes {dimension_semantics = [#tpu.dimension_semantics<parallel>], iteration_bounds = array<i64: 1>, scalar_prefetch = 0 : i64, scratch_operands = 0 : i64, tpu.core_type = #tpu.core_type<tc>, window_params = [{transform_indices = @transform_0, window_bounds = array<i64: 512, 16>}, {pipeline_mode = #tpu.pipeline_mode<synchronous>, transform_indices = @transform_1, window_bounds = array<i64: 16, 16>}, {pipeline_mode = #tpu.pipeline_mode<synchronous>, transform_indices = @transform_2, window_bounds = array<i64: 1, 16>}, {pipeline_mode = #tpu.pipeline_mode<synchronous>, transform_indices = @transform_3, window_bounds = array<i64: 1, 16>}, {pipeline_mode = #tpu.pipeline_mode<synchronous>, transform_indices = @transform_4, window_bounds = array<i64: 16, 16>}, {transform_indices = @transform_5, window_bounds = array<i64: 512, 16>}, {transform_indices = @transform_6, window_bounds = array<i64: 512, 16>}]} {
    %c0 = arith.constant 0 : index
    %c0_0 = arith.constant 0 : index
    %0 = vector.load %arg1[%c0, %c0_0] : memref<512x16xbf16, #tpu.memory_space<vmem>>, vector<512x16xbf16>
    %c0_1 = arith.constant 0 : index
    %c0_2 = arith.constant 0 : index
    %1 = vector.load %arg2[%c0_1, %c0_2] : memref<16x16xbf16, #tpu.memory_space<vmem>>, vector<16x16xbf16>
    %cst = arith.constant dense<0.000000e+00> : vector<512x16xf32>
    %2 = tpu.matmul %0, %1, %cst {dimension_numbers = #tpu.dot_dimension_numbers<[1], [0], [0], [1], [0, 0, 1, 1], [], []>} : vector<512x16xbf16>, vector<16x16xbf16>, vector<512x16xf32> -> vector<512x16xf32>
    %c0_3 = arith.constant 0 : index
    %c0_4 = arith.constant 0 : index
    %3 = vector.load %arg3[%c0_3, %c0_4] : memref<1x16xf32, #tpu.memory_space<vmem>>, vector<1x16xf32>
    %4 = vector.broadcast %3 : vector<1x16xf32> to vector<512x16xf32>
    %5 = arith.mulf %2, %4 : vector<512x16xf32>
    %c0_5 = arith.constant 0 : index
    %c0_6 = arith.constant 0 : index
    %6 = vector.load %arg4[%c0_5, %c0_6] : memref<1x16xf32, #tpu.memory_space<vmem>>, vector<1x16xf32>
    %7 = vector.broadcast %6 : vector<1x16xf32> to vector<512x16xf32>
    %8 = arith.addf %5, %7 : vector<512x16xf32>
    %cst_7 = arith.constant 2.000000e+01 : f32
    %9 = vector.broadcast %cst_7 : f32 to vector<512x16xf32>
    %10 = arith.minimumf %8, %9 : vector<512x16xf32>
    %11 = math.exp %10 : vector<512x16xf32>
    %cst_8 = arith.constant 2.000000e+00 : f32
    %12 = vector.broadcast %cst_8 : f32 to vector<512x16xf32>
    %13 = arith.addf %11, %12 : vector<512x16xf32>
    %14 = arith.mulf %11, %13 : vector<512x16xf32>
    %15 = arith.mulf %8, %14 : vector<512x16xf32>
    %cst_9 = arith.constant 2.000000e+00 : f32
    %16 = vector.broadcast %cst_9 : f32 to vector<512x16xf32>
    %17 = arith.addf %14, %16 : vector<512x16xf32>
    %18 = tpu.reciprocal %17 {approx = true} : vector<512x16xf32> -> vector<512x16xf32>
    %19 = arith.mulf %15, %18 : vector<512x16xf32>
    %20 = arith.truncf %19 : vector<512x16xf32> to vector<512x16xbf16>
    %c0_10 = arith.constant 0 : index
    %c0_11 = arith.constant 0 : index
    %21 = vector.load %arg6[%c0_10, %c0_11] : memref<512x16xbf16, #tpu.memory_space<vmem>>, vector<512x16xbf16>
    tpu.vector_store %arg6[%c0_10, %c0_11], %20 {strides = array<i32>} : memref<512x16xbf16, #tpu.memory_space<vmem>>, vector<512x16xbf16>,
    %c0_12 = arith.constant 0 : index
    %c0_13 = arith.constant 0 : index
    %22 = vector.load %arg5[%c0_12, %c0_13] : memref<16x16xbf16, #tpu.memory_space<vmem>>, vector<16x16xbf16>
    %cst_14 = arith.constant dense<0.000000e+00> : vector<512x16xf32>
    %23 = tpu.matmul %0, %22, %cst_14 {dimension_numbers = #tpu.dot_dimension_numbers<[1], [0], [0], [1], [0, 0, 1, 1], [], []>} : vector<512x16xbf16>, vector<16x16xbf16>, vector<512x16xf32> -> vector<512x16xf32>
    %24 = arith.truncf %23 : vector<512x16xf32> to vector<512x16xbf16>
    %c0_15 = arith.constant 0 : index
    %c0_16 = arith.constant 0 : index
    %25 = vector.load %arg7[%c0_15, %c0_16] : memref<512x16xbf16, #tpu.memory_space<vmem>>, vector<512x16xbf16>
    tpu.vector_store %arg7[%c0_15, %c0_16], %24 {strides = array<i32>} : memref<512x16xbf16, #tpu.memory_space<vmem>>, vector<512x16xbf16>,
    return
  }
  func.func @transform_0(%arg0: i32) -> (i32, i32) {
    %c0_i32 = arith.constant 0 : i32
    %c0_i32_0 = arith.constant 0 : i32
    return %arg0, %c0_i32 : i32, i32
  }
  func.func @transform_1(%arg0: i32) -> (i32, i32) {
    %c0_i32 = arith.constant 0 : i32
    %c0_i32_0 = arith.constant 0 : i32
    %c0_i32_1 = arith.constant 0 : i32
    return %c0_i32, %c0_i32_0 : i32, i32
  }
  func.func @transform_2(%arg0: i32) -> (i32, i32) {
    %c0_i32 = arith.constant 0 : i32
    %c0_i32_0 = arith.constant 0 : i32
    %c0_i32_1 = arith.constant 0 : i32
    return %c0_i32, %c0_i32_0 : i32, i32
  }
  func.func @transform_3(%arg0: i32) -> (i32, i32) {
    %c0_i32 = arith.constant 0 : i32
    %c0_i32_0 = arith.constant 0 : i32
    %c0_i32_1 = arith.constant 0 : i32
    return %c0_i32, %c0_i32_0 : i32, i32
  }
  func.func @transform_4(%arg0: i32) -> (i32, i32) {
    %c0_i32 = arith.constant 0 : i32
    %c0_i32_0 = arith.constant 0 : i32
    %c0_i32_1 = arith.constant 0 : i32
    return %c0_i32, %c0_i32_0 : i32, i32
  }
  func.func @transform_5(%arg0: i32) -> (i32, i32) {
    %c0_i32 = arith.constant 0 : i32
    %c0_i32_0 = arith.constant 0 : i32
    return %arg0, %c0_i32 : i32, i32
  }
  func.func @transform_6(%arg0: i32) -> (i32, i32) {
    %c0_i32 = arith.constant 0 : i32
    %c0_i32_0 = arith.constant 0 : i32
    return %arg0, %c0_i32 : i32, i32
  }
}

</mosaic_0001>

<bundles_post_ra>
// kernel: tpu_custom_call.1
= control target key start
LH: loop header
LB: loop body
LE: loop exit
PB: predicated region body
PF: predicated region fallthrough
CT: control target
= control target key end

     0   :  { %vm255_vm0 = vcmask 130048   ;;  %vm1615_vm1 = vcmask 125952   ;;  %s4739_s1 = inlined_call_operand.vmem [shape: bf16[16,16], index: 1, kind: input, shape index: {}]   ;;  %s4740_s0 = inlined_call_operand.vmem [shape: bf16[512,16], index: 0, kind: input, shape index: {}]   ;;  %s4741_s4 = inlined_call_operand.vmem [shape: bf16[16,16], index: 4, kind: input, shape index: {}]   ;;  %s4742_s2 = inlined_call_operand.vmem [shape: f32[1,16], index: 2, kind: input, shape index: {}]   ;;  %s4743_s3 = inlined_call_operand.vmem [shape: f32[1,16], index: 3, kind: input, shape index: {}]   ;;  %s4744_s6 = inlined_call_operand.vmem [shape: bf16[512,16], index: 6, kind: output, shape index: {1}]   ;;  %s4745_s5 = inlined_call_operand.vmem [shape: bf16[512,16], index: 5, kind: output, shape index: {0}]  }
   0x1   :  { %v2859_v0 = vld [vmem:[%s4739_s1] sm:$0xff]   ;;  %v2861_v2 = vld [vmem:[%s4740_s0 + $0x8] sm:$0xff]   ;;  %v2862_v3 = vld [vmem:[%s4740_s0 + $0x10] sm:$0xff]  }
   0x2   :  { %v2860_v1 = vld [vmem:[%s4740_s0] sm:$0xff]   ;;  %2727 = vmatprep.subr.bf16.mxu0 %v2859_v0  ;;  %v2863_v4 = vld [vmem:[%s4740_s0 + $0x18] sm:$0xff]   ;;  %v2865_v7 = vld [vmem:[%s4740_s0 + $0x28] sm:$0xff]  }
   0x3   :  { %2728 = vmatpush3.bf16.msra.mxu0 %v2859_v0  ;;  %2729 = vmatprep.mubr.msk.bf16.mxu0 %vm255_vm0, %v2860_v1  ;;  %v2864_v5 = vld [vmem:[%s4740_s0 + $0x20] sm:$0xff]   ;;  %v2866_v8 = vld [vmem:[%s4740_s0 + $0x30] sm:$0xff]   ;;  %v2867_v9 = vld [vmem:[%s4740_s0 + $0x38] sm:$0xff]  }
   0x4   :  { %2795 = vmatprep.mubr.msk.bf16.mxu1 %vm255_vm0, %v2860_v1  ;;  %v2870_v6 = vld [vmem:[%s4741_s4] sm:$0xff]   ;;  %v2869_v11 = vld [vmem:[%s4740_s0 + $0x48] sm:$0xff]   ;;  %v2871_v12 = vld [vmem:[%s4740_s0 + $0x50] sm:$0xff]  }
   0x5   :  { %2793 = vmatprep.subr.bf16.mxu1 %v2870_v6  ;;  %v2868_v10 = vld [vmem:[%s4740_s0 + $0x40] sm:$0xff]   ;;  %v2872_v13 = vld [vmem:[%s4740_s0 + $0x58] sm:$0xff]   ;;  %v2874_v15 = vld [vmem:[%s4740_s0 + $0x68] sm:$0xff]  }
   0x6   :  { %2730 = vmatmul.mubr.msk.bf16.vlgmr.msra.gmra.mxu0 %vm255_vm0, %v2861_v2  ;;  %2794 = vmatpush3.bf16.msra.mxu1 %v2870_v6  ;;  %v2873_v14 = vld [vmem:[%s4740_s0 + $0x60] sm:$0xff]   ;;  %v2875_v16 = vld [vmem:[%s4740_s0 + $0x70] sm:$0xff]   ;;  %v2876_v17 = vld [vmem:[%s4740_s0 + $0x78] sm:$0xff]  }
   0x7   :  { %2733 = vmatprep.mubr.msk.bf16.mxu0 %vm255_vm0, %v2862_v3  ;;  %v2877_v18 = vld [vmem:[%s4740_s0 + $0x80] sm:$0xff]   ;;  %v2878_v19 = vld [vmem:[%s4740_s0 + $0x88] sm:$0xff]   ;;  %v2879_v20 = vld [vmem:[%s4740_s0 + $0x90] sm:$0xff]  }
   0x8   :  { %v2880_v21 = vld [vmem:[%s4740_s0 + $0x98] sm:$0xff]   ;;  %v2881_v22 = vld [vmem:[%s4740_s0 + $0xa0] sm:$0xff]   ;;  %v2882_v23 = vld [vmem:[%s4740_s0 + $0xa8] sm:$0xff]  }
   0x9   :  { %2796 = vmatmul.mubr.msk.bf16.vlgmr.msra.gmra.mxu1 %vm255_vm0, %v2861_v2  ;;  %v2883_v24 = vld [vmem:[%s4740_s0 + $0xb0] sm:$0xff]   ;;  %v2884_v25 = vld [vmem:[%s4740_s0 + $0xb8] sm:$0xff]   ;;  %v2885_v26 = vld [vmem:[%s4740_s0 + $0xc0] sm:$0xff]  }
   0xa   :  { %2799 = vmatprep.mubr.msk.bf16.mxu1 %vm255_vm0, %v2862_v3  ;;  %v2886_v27 = vld [vmem:[%s4740_s0 + $0xc8] sm:$0xff]   ;;  %v2887_v28 = vld [vmem:[%s4740_s0 + $0xd0] sm:$0xff]   ;;  %v2888_v29 = vld [vmem:[%s4740_s0 + $0xd8] sm:$0xff]  }
   0xb   :  { %v2889_v30 = vld [vmem:[%s4740_s0 + $0xe0] sm:$0xff]   ;;  %v2890_v31 = vld [vmem:[%s4740_s0 + $0xe8] sm:$0xff]   ;;  %v2891_v32 = vld [vmem:[%s4740_s0 + $0xf0] sm:$0xff]  }
   0xc   :  { %v2892_v33 = vld [vmem:[%s4740_s0 + $0xf8] sm:$0xff]   ;;  %v3356_v34 = vld [vmem:[%s4742_s2] ss:$0 sm:$0xff] }
   0xd   :  { %v3361_v36 = vld [vmem:[%s4743_s3] ss:$0 sm:$0xff] }
   0xe   :  { %2734 = vmatmul.mubr.msk.bf16.gmra.mxu0 %vm255_vm0, %v2863_v4 }
   0xf   :  { %2737 = vmatprep.mubr.msk.bf16.mxu0 %vm255_vm0, %v2864_v5 }
  0x11   :  { %2800 = vmatmul.mubr.msk.bf16.gmra.mxu1 %vm255_vm0, %v2863_v4 }
  0x12   :  { %2803 = vmatprep.mubr.msk.bf16.mxu1 %vm255_vm0, %v2864_v5 }
  0x16   :  { %2738 = vmatmul.mubr.msk.bf16.gmra.mxu0 %vm255_vm0, %v2865_v7 }
  0x17   :  { %2741 = vmatprep.mubr.msk.bf16.mxu0 %vm255_vm0, %v2866_v8 }
  0x19   :  { %2804 = vmatmul.mubr.msk.bf16.gmra.mxu1 %vm255_vm0, %v2865_v7 }
  0x1a   :  { %2807 = vmatprep.mubr.msk.bf16.mxu1 %vm255_vm0, %v2866_v8 }
  0x1e   :  { %2742 = vmatmul.mubr.msk.bf16.gmra.mxu0 %vm255_vm0, %v2867_v9 }
  0x1f   :  { %2745 = vmatprep.mubr.msk.bf16.mxu0 %vm255_vm0, %v2868_v10 }
  0x21   :  { %2808 = vmatmul.mubr.msk.bf16.gmra.mxu1 %vm255_vm0, %v2867_v9 }
  0x22   :  { %2811 = vmatprep.mubr.msk.bf16.mxu1 %vm255_vm0, %v2868_v10 }
  0x26   :  { %2746 = vmatmul.mubr.msk.bf16.gmra.mxu0 %vm255_vm0, %v2869_v11 }
  0x27   :  { %2749 = vmatprep.mubr.msk.bf16.mxu0 %vm255_vm0, %v2871_v12 }
  0x29   :  { %2812 = vmatmul.mubr.msk.bf16.gmra.mxu1 %vm255_vm0, %v2869_v11 }
  0x2a   :  { %2815 = vmatprep.mubr.msk.bf16.mxu1 %vm255_vm0, %v2871_v12 }
  0x2e   :  { %2750 = vmatmul.mubr.msk.bf16.gmra.mxu0 %vm255_vm0, %v2872_v13 }
  0x2f   :  { %2753 = vmatprep.mubr.msk.bf16.mxu0 %vm255_vm0, %v2873_v14 }
  0x31   :  { %2816 = vmatmul.mubr.msk.bf16.gmra.mxu1 %vm255_vm0, %v2872_v13 }
  0x32   :  { %2819 = vmatprep.mubr.msk.bf16.mxu1 %vm255_vm0, %v2873_v14 }
  0x36   :  { %2754 = vmatmul.mubr.msk.bf16.gmra.mxu0 %vm255_vm0, %v2874_v15 }
  0x37   :  { %2757 = vmatprep.mubr.msk.bf16.mxu0 %vm255_vm0, %v2875_v16 }
  0x39   :  { %2820 = vmatmul.mubr.msk.bf16.gmra.mxu1 %vm255_vm0, %v2874_v15 }
  0x3a   :  { %2823 = vmatprep.mubr.msk.bf16.mxu1 %vm255_vm0, %v2875_v16 }
  0x3e   :  { %2758 = vmatmul.mubr.msk.bf16.gmra.mxu0 %vm255_vm0, %v2876_v17 }
  0x3f   :  { %2761 = vmatprep.mubr.msk.bf16.mxu0 %vm255_vm0, %v2877_v18 }
  0x41   :  { %2824 = vmatmul.mubr.msk.bf16.gmra.mxu1 %vm255_vm0, %v2876_v17 }
  0x42   :  { %2827 = vmatprep.mubr.msk.bf16.mxu1 %vm255_vm0, %v2877_v18 }
  0x46   :  { %2762 = vmatmul.mubr.msk.bf16.gmra.mxu0 %vm255_vm0, %v2878_v19 }
  0x47   :  { %2765 = vmatprep.mubr.msk.bf16.mxu0 %vm255_vm0, %v2879_v20 }
  0x49   :  { %2828 = vmatmul.mubr.msk.bf16.gmra.mxu1 %vm255_vm0, %v2878_v19 }
  0x4a   :  { %2831 = vmatprep.mubr.msk.bf16.mxu1 %vm255_vm0, %v2879_v20 }
  0x4e   :  { %2766 = vmatmul.mubr.msk.bf16.gmra.mxu0 %vm255_vm0, %v2880_v21 }
  0x4f   :  { %2769 = vmatprep.mubr.msk.bf16.mxu0 %vm255_vm0, %v2881_v22 }
  0x51   :  { %2832 = vmatmul.mubr.msk.bf16.gmra.mxu1 %vm255_vm0, %v2880_v21 }
  0x52   :  { %2835 = vmatprep.mubr.msk.bf16.mxu1 %vm255_vm0, %v2881_v22 }
  0x56   :  { %2770 = vmatmul.mubr.msk.bf16.gmra.mxu0 %vm255_vm0, %v2882_v23 }
  0x57   :  { %2773 = vmatprep.mubr.msk.bf16.mxu0 %vm255_vm0, %v2883_v24 }
  0x59   :  { %2836 = vmatmul.mubr.msk.bf16.gmra.mxu1 %vm255_vm0, %v2882_v23 }
  0x5a   :  { %2839 = vmatprep.mubr.msk.bf16.mxu1 %vm255_vm0, %v2883_v24 }
  0x5e   :  { %2774 = vmatmul.mubr.msk.bf16.gmra.mxu0 %vm255_vm0, %v2884_v25 }
  0x5f   :  { %2777 = vmatprep.mubr.msk.bf16.mxu0 %vm255_vm0, %v2885_v26 }
  0x61   :  { %2840 = vmatmul.mubr.msk.bf16.gmra.mxu1 %vm255_vm0, %v2884_v25 }
  0x62   :  { %2843 = vmatprep.mubr.msk.bf16.mxu1 %vm255_vm0, %v2885_v26 }
  0x66   :  { %2778 = vmatmul.mubr.msk.bf16.gmra.mxu0 %vm255_vm0, %v2886_v27 }
  0x67   :  { %2781 = vmatprep.mubr.msk.bf16.mxu0 %vm255_vm0, %v2887_v28 }
  0x69   :  { %2844 = vmatmul.mubr.msk.bf16.gmra.mxu1 %vm255_vm0, %v2886_v27 }
  0x6a   :  { %2847 = vmatprep.mubr.msk.bf16.mxu1 %vm255_vm0, %v2887_v28 }
  0x6e   :  { %2782 = vmatmul.mubr.msk.bf16.gmra.mxu0 %vm255_vm0, %v2888_v29 }
  0x6f   :  { %2785 = vmatprep.mubr.msk.bf16.mxu0 %vm255_vm0, %v2889_v30 }
  0x71   :  { %2848 = vmatmul.mubr.msk.bf16.gmra.mxu1 %vm255_vm0, %v2888_v29 }
  0x72   :  { %2851 = vmatprep.mubr.msk.bf16.mxu1 %vm255_vm0, %v2889_v30 }
  0x76   :  { %2786 = vmatmul.mubr.msk.bf16.gmra.mxu0 %vm255_vm0, %v2890_v31 }
  0x77   :  { %2789 = vmatprep.mubr.msk.bf16.mxu0 %vm255_vm0, %v2891_v32 }
  0x79   :  { %2852 = vmatmul.mubr.msk.bf16.gmra.mxu1 %vm255_vm0, %v2890_v31 }
  0x7a   :  { %2855 = vmatprep.mubr.msk.bf16.mxu1 %vm255_vm0, %v2891_v32 }
  0x7e   :  { %2790 = vmatmul.mubr.msk.bf16.gmra.mxu0 %vm255_vm0, %v2892_v33 }
  0x81   :  { %2856 = vmatmul.mubr.msk.bf16.gmra.mxu1 %vm255_vm0, %v2892_v33 }
  0xc6   :  { %v2731_v35 = vpop.f32.mrf.mxu0 }
  0xc7   :  { %v650_v37 = vmul.f32 %v2731_v35, %v3356_v34 }
  0xc8   :  { %v386_v38 = vpop.f32.mrf.mxu0 }
  0xc9   :  { %v3365_v39 = vadd.f32 %v3361_v36, %v650_v37  ;;  %v648_v40 = vmul.f32 %v3356_v34, %v386_v38  ;;  %v2797_v59 = vpop.f32.mrf.mxu1 }
  0xca   :  { %v2732_v41 = vpop.f32.mrf.mxu0  ;;  %v2599_v62 = vpack.c.bf16 %v2797_v59, %v2797_v59 }
  0xcb   :  { %v785_v42 = vmin.f32 %v3365_v39, 20.0  ;;  %v3370_v43 = vadd.f32 %v3361_v36, %v648_v40  ;;  %v651_v44 = vmul.f32 %v2732_v41, %v3356_v34  ;;  %v1722_v2 = vpop.f32.mrf.mxu1 }
  0xcc   :  { %v389_v45 = vpop.f32.mrf.mxu0  ;;  %2235 = vst.msk [vmem:[%s4744_s6 + $0x8] sm:$0xf] %vm1615_vm1, %v2599_v62  ;;  %v2597_v5 = vpack.c.bf16 %v1722_v2, %v1722_v2 }
  0xcd   :  { %v851_v46 = vmul.f32 1.442695, %v785_v42  ;;  %v783_v47 = vmin.f32 %v3370_v43, 20.0  ;;  %v3375_v48 = vadd.f32 %v3361_v36, %v651_v44  ;;  %v649_v49 = vmul.f32 %v3356_v34, %v389_v45  ;;  %v2798_v9 = vpop.f32.mrf.mxu1 }
  0xce   :  { %v2735_v50 = vpop.f32.mrf.mxu0  ;;  %2233 = vst.msk [vmem:[%s4744_s6] sm:$0xf] %vm1615_vm1, %v2597_v5  ;;  %v2600_v12 = vpack.c.bf16 %v2798_v9, %v2798_v9 }
  0xcf   :  { %2893 = vpow2.f32 %v851_v46  ;;  %v847_v51 = vmul.f32 1.442695, %v783_v47  ;;  %v786_v52 = vmin.f32 %v3375_v48, 20.0  ;;  %v3380_v53 = vadd.f32 %v3361_v36, %v649_v49  ;;  %v1725_v17 = vpop.f32.mrf.mxu1 }
  0xd0   :  { %v654_v54 = vmul.f32 %v2735_v50, %v3356_v34  ;;  %v402_v55 = vpop.f32.mrf.mxu0  ;;  %2236 = vst.msk [vmem:[%s4744_s6 + $0xc] sm:$0xf] %vm1615_vm1, %v2600_v12  ;;  %v2598_v19 = vpack.c.bf16 %v1725_v17, %v1725_v17 }
  0xd1   :  { %2895 = vpow2.f32 %v847_v51  ;;  %v853_v56 = vmul.f32 1.442695, %v786_v52  ;;  %v784_v57 = vmin.f32 %v3380_v53, 20.0  ;;  %v652_v58 = vmul.f32 %v3356_v34, %v402_v55  ;;  %v2801_v23 = vpop.f32.mrf.mxu1 }
  0xd2   :  { %v3386_v60 = vadd.f32 %v3361_v36, %v654_v54  ;;  %v2736_v61 = vpop.f32.mrf.mxu0  ;;  %2234 = vst.msk [vmem:[%s4744_s6 + $0x4] sm:$0xf] %vm1615_vm1, %v2598_v19  ;;  %v2603_v26 = vpack.c.bf16 %v2801_v23, %v2801_v23 }
  0xd3   :  { %2897 = vpow2.f32 %v853_v56  ;;  %v849_v63 = vmul.f32 1.442695, %v784_v57  ;;  %v3389_v0 = vadd.f32 %v3361_v36, %v652_v58  ;;  %v655_v1 = vmul.f32 %v2736_v61, %v3356_v34  ;;  %v1738_v30 = vpop.f32.mrf.mxu1 }
  0xd4   :  { %v789_v3 = vmin.f32 %v3386_v60, 20.0  ;;  %v405_v4 = vpop.f32.mrf.mxu0  ;;  %2239 = vst.msk [vmem:[%s4744_s6 + $0x18] sm:$0xf] %vm1615_vm1, %v2603_v26  ;;  %v2601_v35 = vpack.c.bf16 %v1738_v30, %v1738_v30 }
  0xd5   :  { %2899 = vpow2.f32 %v849_v63  ;;  %v787_v6 = vmin.f32 %v3389_v0, 20.0  ;;  %v3399_v7 = vadd.f32 %v3361_v36, %v655_v1  ;;  %v653_v8 = vmul.f32 %v3356_v34, %v405_v4  ;;  %v2802_v41 = vpop.f32.mrf.mxu1 }
  0xd6   :  { %v859_v10 = vmul.f32 1.442695, %v789_v3  ;;  %v2739_v11 = vpop.f32.mrf.mxu0  ;;  %2237 = vst.msk [vmem:[%s4744_s6 + $0x10] sm:$0xf] %vm1615_vm1, %v2601_v35  ;;  %v2604_v47 = vpack.c.bf16 %v2802_v41, %v2802_v41 }
  0xd7   :  { %v855_v13 = vmul.f32 1.442695, %v787_v6  ;;  %v790_v14 = vmin.f32 %v3399_v7, 20.0  ;;  %v3408_v15 = vadd.f32 %v3361_v36, %v653_v8  ;;  %v658_v16 = vmul.f32 %v2739_v11, %v3356_v34  ;;  %v1741_v52 = vpop.f32.mrf.mxu1 }
  0xd8   :  { %2901 = vpow2.f32 %v859_v10  ;;  %v418_v18 = vpop.f32.mrf.mxu0  ;;  %2240 = vst.msk [vmem:[%s4744_s6 + $0x1c] sm:$0xf] %vm1615_vm1, %v2604_v47  ;;  %v2602_v59 = vpack.c.bf16 %v1741_v52, %v1741_v52 }
  0xd9   :  { %2903 = vpow2.f32 %v855_v13  ;;  %v861_v20 = vmul.f32 1.442695, %v790_v14  ;;  %v788_v21 = vmin.f32 %v3408_v15, 20.0  ;;  %v3417_v22 = vadd.f32 %v3361_v36, %v658_v16  ;;  %v3451_v1 = vpop.f32.mrf.mxu1 }
  0xda   :  { %v656_v24 = vmul.f32 %v3356_v34, %v418_v18  ;;  %v2740_v25 = vpop.f32.mrf.mxu0  ;;  %2238 = vst.msk [vmem:[%s4744_s6 + $0x14] sm:$0xf] %vm1615_vm1, %v2602_v59 }
  0xdb   :  { %2905 = vpow2.f32 %v861_v20  ;;  %v857_v27 = vmul.f32 1.442695, %v788_v21  ;;  %v793_v28 = vmin.f32 %v3417_v22, 20.0  ;;  %v659_v29 = vmul.f32 %v2740_v25, %v3356_v34  ;;  %v3461_v10 = vpop.f32.mrf.mxu1 }
  0xdc   :  { %v2894_v31 = vpop.eup %2893  ;;  %v3427_v32 = vadd.f32 %v3361_v36, %v656_v24  ;;  %v421_v33 = vpop.f32.mrf.mxu0 }
  0xdd   :  { %v977_v37 = vadd.f32 2.0, %v2894_v31  ;;  %2907 = vpow2.f32 %v857_v27  ;;  %v867_v38 = vmul.f32 1.442695, %v793_v28  ;;  %v3434_v40 = vadd.f32 %v3361_v36, %v659_v29  ;;  %v3465_v19 = vpop.f32.mrf.mxu1 }
  0xde   :  { %v2896_v42 = vpop.eup %2895  ;;  %v791_v44 = vmin.f32 %v3427_v32, 20.0  ;;  %v657_v45 = vmul.f32 %v3356_v34, %v421_v33  ;;  %v2743_v46 = vpop.f32.mrf.mxu0 }
  0xdf   :  { %v1041_v49 = vmul.f32 %v2894_v31, %v977_v37  ;;  %v975_v50 = vadd.f32 2.0, %v2896_v42  ;;  %2909 = vpow2.f32 %v867_v38  ;;  %v794_v51 = vmin.f32 %v3434_v40, 20.0  ;;  %v3471_v29 = vpop.f32.mrf.mxu1 }
  0xe0   :  { %v2898_v54 = vpop.eup %2897  ;;  %v863_v55 = vmul.f32 1.442695, %v791_v44  ;;  %v3444_v56 = vadd.f32 %v3361_v36, %v657_v45  ;;  %v662_v57 = vmul.f32 %v2743_v46, %v3356_v34  ;;  %v434_v58 = vpop.f32.mrf.mxu0 }
  0xe1   :  { %v1169_v61 = vadd.f32 2.0, %v1041_v49  ;;  %v1039_v62 = vmul.f32 %v2896_v42, %v975_v50  ;;  %v978_v63 = vadd.f32 2.0, %v2898_v54  ;;  %v869_v3 = vmul.f32 1.442695, %v794_v51  ;;  %v3478_v45 = vpop.f32.mrf.mxu1 }
  0xe2   :  { %v2900_v2 = vpop.eup %2899  ;;  %2911 = vpow2.f32 %v863_v55  ;;  %v792_v4 = vmin.f32 %v3444_v56, 20.0  ;;  %v3455_v5 = vadd.f32 %v3361_v36, %v662_v57  ;;  %v2744_v6 = vpop.f32.mrf.mxu0  ;;  %v660_v18 = vmul.f32 %v3356_v34, %v434_v58 }
  0xe3   :  { %2913 = vrcp.f32 %v1169_v61  ;;  %v1167_v8 = vadd.f32 2.0, %v1039_v62  ;;  %v1042_v9 = vmul.f32 %v2898_v54, %v978_v63  ;;  %v976_v11 = vadd.f32 2.0, %v2900_v2  ;;  %v3485_v57 = vpop.f32.mrf.mxu1 }
  0xe4   :  { %2915 = vpow2.f32 %v869_v3  ;;  %v865_v12 = vmul.f32 1.442695, %v792_v4  ;;  %v797_v13 = vmin.f32 %v3455_v5, 20.0  ;;  %v437_v14 = vpop.f32.mrf.mxu0  ;;  %v3468_v27 = vadd.f32 %v3361_v36, %v660_v18 }
  0xe5   :  { %v2902_v16 = vpop.eup %2901  ;;  %2917 = vrcp.f32 %v1167_v8  ;;  %v1170_v17 = vadd.f32 2.0, %v1042_v9  ;;  %v1040_v21 = vmul.f32 %v2900_v2, %v976_v11  ;;  %v663_v28 = vmul.f32 %v2744_v6, %v3356_v34  ;;  %v3496_v3 = vpop.f32.mrf.mxu1 }
  0xe6   :  { %v2904_v20 = vpop.eup %2903  ;;  %v981_v23 = vadd.f32 2.0, %v2902_v16  ;;  %2919 = vpow2.f32 %v865_v12  ;;  %v875_v24 = vmul.f32 1.442695, %v797_v13  ;;  %v2747_v25 = vpop.f32.mrf.mxu0  ;;  %v1105_v31 = vmul.f32 %v1041_v49, %v3365_v39 }
  0xe7   :  { %2921 = vrcp.f32 %v1170_v17  ;;  %v979_v26 = vadd.f32 2.0, %v2904_v20  ;;  %v1168_v33 = vadd.f32 2.0, %v1040_v21  ;;  %v795_v42 = vmin.f32 %v3468_v27, 20.0 }
  0xe8   :  { %v2906_v30 = vpop.eup %2905  ;;  %v1045_v35 = vmul.f32 %v2902_v16, %v981_v23  ;;  %2923 = vpow2.f32 %v875_v24  ;;  %v450_v37 = vpop.f32.mrf.mxu0  ;;  %v3476_v44 = vadd.f32 %v3361_v36, %v663_v28  ;;  %v1103_v47 = vmul.f32 %v1039_v62, %v3370_v43 }
  0xe9   :  { %v1043_v38 = vmul.f32 %v2904_v20, %v979_v26  ;;  %v982_v41 = vadd.f32 2.0, %v2906_v30  ;;  %2925 = vrcp.f32 %v1168_v33  ;;  %v661_v39 = vmul.f32 %v3356_v34, %v437_v14  ;;  %v3505_v14 = vpop.f32.mrf.mxu1 }
  0xea   :  { %v2908_v46 = vpop.eup %2907  ;;  %v1173_v50 = vadd.f32 2.0, %v1045_v35  ;;  %v3482_v49 = vpop.f32.mrf.mxu0  ;;  %v1106_v51 = vmul.f32 %v1042_v9, %v3375_v48  ;;  %v871_v59 = vmul.f32 1.442695, %v795_v42  ;;  %v798_v61 = vmin.f32 %v3476_v44, 20.0 }
  0xeb   :  { %v1171_v52 = vadd.f32 2.0, %v1043_v38  ;;  %v1046_v54 = vmul.f32 %v2906_v30, %v982_v41  ;;  %v980_v55 = vadd.f32 2.0, %v2908_v46  ;;  %v3489_v43 = vadd.f32 %v3361_v36, %v661_v39  ;;  %v3513_v28 = vpop.f32.mrf.mxu1 }
  0xec   :  { %v2910_v58 = vpop.eup %2909  ;;  %2927 = vrcp.f32 %v1173_v50  ;;  %v3491_v62 = vpop.f32.mrf.mxu0  ;;  %v3494_v63 = vmul.f32 %v1040_v21, %v3380_v53  ;;  %v877_v6 = vmul.f32 1.442695, %v798_v61  ;;  %v3502_v12 = vmul.f32 %v1045_v35, %v3386_v60 }
  0xed   :  { %2929 = vrcp.f32 %v1171_v52  ;;  %v1174_v48 = vadd.f32 2.0, %v1046_v54  ;;  %v1044_v2 = vmul.f32 %v2908_v46, %v980_v55  ;;  %v985_v4 = vadd.f32 2.0, %v2910_v58 }
  0xee   :  { %2931 = vpow2.f32 %v871_v59  ;;  %v796_v8 = vmin.f32 %v3489_v43, 20.0  ;;  %v3499_v9 = vpop.f32.mrf.mxu0  ;;  %v666_v53 = vmul.f32 %v2747_v25, %v3356_v34  ;;  %v1107_v26 = vmul.f32 %v1043_v38, %v3389_v0 }
  0xef   :  { %v2912_v11 = vpop.eup %2911  ;;  %2933 = vrcp.f32 %v1174_v48  ;;  %v1172_v13 = vadd.f32 2.0, %v1044_v2  ;;  %v1049_v17 = vmul.f32 %v2910_v58, %v985_v4  ;;  %v664_v41 = vmul.f32 %v3356_v34, %v450_v37 }
  0xf0   :  { %v2914_v16 = vpop.eup %2913  ;;  %v983_v18 = vadd.f32 2.0, %v2912_v11  ;;  %2935 = vpow2.f32 %v877_v6  ;;  %v873_v20 = vmul.f32 1.442695, %v796_v8  ;;  %v3507_v21 = vpop.f32.mrf.mxu0  ;;  %v3511_v60 = vadd.f32 %v3361_v36, %v666_v53 }
  0xf1   :  { %v2916_v23 = vpop.eup %2915  ;;  %v1297_v24 = vmul.f32 %v2914_v16, %v1105_v31  ;;  %2937 = vrcp.f32 %v1172_v13  ;;  %v1177_v30 = vadd.f32 2.0, %v1049_v17  ;;  %v3519_v31 = vpop.f32.mrf.mxu1  ;;  %v1110_v52 = vmul.f32 %v1046_v54, %v3399_v7 }
  0xf2   :  { %v2918_v25 = vpop.eup %2917  ;;  %v1047_v33 = vmul.f32 %v2912_v11, %v983_v18  ;;  %v986_v35 = vadd.f32 2.0, %v2916_v23  ;;  %v3516_v42 = vpop.f32.mrf.mxu0  ;;  %2939 = vpow2.f32 %v873_v20  ;;  %v801_v0 = vmin.f32 %v3511_v60, 20.0 }
  0xf3   :  { %v2920_v46 = vpop.eup %2919  ;;  %v2535_v50 = vpack.c.bf16 %v1297_v24, %v1297_v24  ;;  %v1295_v39 = vmul.f32 %v2918_v25, %v1103_v47  ;;  %2941 = vrcp.f32 %v1177_v30  ;;  %v3530_v6 = vpop.f32.mrf.mxu1  ;;  %v1108_v7 = vmul.f32 %v1044_v2, %v3408_v15 }
  0xf4   :  { %v2922_v38 = vpop.eup %2921  ;;  %v1175_v55 = vadd.f32 2.0, %v1047_v33  ;;  %v3522_v58 = vmul.f32 %v2916_v23, %v986_v35  ;;  %v3524_v59 = vpop.f32.mrf.mxu0  ;;  %v984_v48 = vadd.f32 2.0, %v2920_v46  ;;  %v883_v4 = vmul.f32 1.442695, %v801_v0 }
  0xf5   :  { %v2924_v37 = vpop.eup %2923  ;;  %1618 = vst.msk [vmem:[%s4745_s5 + $0x8] sm:$0xf] %vm1615_vm1, %v2535_v50  ;;  %v2533_v47 = vpack.c.bf16 %v1295_v39, %v1295_v39  ;;  %v1298_v61 = vmul.f32 %v2922_v38, %v1106_v51  ;;  %v3543_v16 = vadd.f32 %v3361_v36, %v664_v41  ;;  %v3545_v15 = vpop.f32.mrf.mxu1  ;;  %v667_v20 = vmul.f32 %v3482_v49, %v3356_v34 }
  0xf6   :  { %2943 = vrcp.f32 %v1175_v55  ;;  %v1178_v54 = vadd.f32 2.0, %v3522_v58  ;;  %v989_v8 = vadd.f32 2.0, %v2924_v37  ;;  %v3534_v11 = vpop.f32.mrf.mxu0  ;;  %v2926_v13 = vpop.eup %2925  ;;  %v3540_v51 = vmul.f32 %v2920_v46, %v984_v48 }
  0xf7   :  { %1616 = vst.msk [vmem:[%s4745_s5] sm:$0xf] %vm1615_vm1, %v2533_v47  ;;  %v2536_v53 = vpack.c.bf16 %v1298_v61, %v1298_v61  ;;  %2945 = vpow2.f32 %v883_v4  ;;  %v1296_v2 = vmul.f32 %v2926_v13, %v3494_v63  ;;  %v1113_v25 = vmul.f32 %v1049_v17, %v3417_v22  ;;  %v3563_v41 = vpop.f32.mrf.mxu1 }
  0xf8   :  { %2947 = vrcp.f32 %v1178_v54  ;;  %v3548_v18 = vmul.f32 %v2924_v37, %v989_v8  ;;  %v3552_v23 = vpop.f32.mrf.mxu0  ;;  %v1176_v30 = vadd.f32 2.0, %v3540_v51  ;;  %v799_v63 = vmin.f32 %v3543_v16, 20.0 }
  0xf9   :  { %v2928_v24 = vpop.eup %2927  ;;  %1619 = vst.msk [vmem:[%s4745_s5 + $0xc] sm:$0xf] %vm1615_vm1, %v2536_v53  ;;  %v665_v35 = vmul.f32 %v3356_v34, %v3491_v62  ;;  %v2534_v46 = vpack.c.bf16 %v1296_v2, %v1296_v2  ;;  %v1111_v39 = vmul.f32 %v1047_v33, %v3427_v32  ;;  %v3571_v37 = vadd.f32 %v3361_v36, %v667_v20  ;;  %v3573_v62 = vpop.f32.mrf.mxu1 }
  0xfa   :  { %v2930_v49 = vpop.eup %2929  ;;  %v1301_v50 = vmul.f32 %v2928_v24, %v3502_v12  ;;  %v1181_v0 = vadd.f32 2.0, %v3548_v18  ;;  %v3568_v38 = vpop.f32.mrf.mxu0  ;;  %2949 = vrcp.f32 %v1176_v30  ;;  %v879_v55 = vmul.f32 1.442695, %v799_v63 }
  0xfb   :  { %v2932_v22 = vpop.eup %2931  ;;  %v1299_v17 = vmul.f32 %v2930_v49, %v1107_v26  ;;  %1617 = vst.msk [vmem:[%s4745_s5 + $0x4] sm:$0xf] %vm1615_vm1, %v2534_v46  ;;  %v3580_v33 = vadd.f32 %v3361_v36, %v665_v35  ;;  %v802_v54 = vmin.f32 %v3571_v37, 20.0  ;;  %v3585_v8 = vpop.f32.mrf.mxu1  ;;  %v670_v24 = vmul.f32 %v3499_v9, %v3356_v34 }
  0xfc   :  { %v2934_v47 = vpop.eup %2933  ;;  %v2539_v32 = vpack.c.bf16 %v1301_v50, %v1301_v50  ;;  %2951 = vrcp.f32 %v1181_v0  ;;  %v987_v12 = vadd.f32 2.0, %v2932_v22  ;;  %v3582_v26 = vpop.f32.mrf.mxu0  ;;  %v668_v49 = vmul.f32 %v3356_v34, %v3507_v21 }
  0xfd   :  { %v2936_v61 = vpop.eup %2935  ;;  %v2537_v48 = vpack.c.bf16 %v1299_v17, %v1299_v17  ;;  %v1302_v4 = vmul.f32 %v2934_v47, %v1110_v52  ;;  %2953 = vpow2.f32 %v879_v55  ;;  %v800_v20 = vmin.f32 %v3580_v33, 20.0  ;;  %v3604_v46 = vpop.f32.mrf.mxu1 }
  0xfe   :  { %v2938_v13 = vpop.eup %2937  ;;  %1622 = vst.msk [vmem:[%s4745_s5 + $0x18] sm:$0xf] %vm1615_vm1, %v2539_v32  ;;  %v3591_v53 = vmul.f32 %v2932_v22, %v987_v12  ;;  %v990_v2 = vadd.f32 2.0, %v2936_v61  ;;  %v3596_v52 = vpop.f32.mrf.mxu0  ;;  %v885_v35 = vmul.f32 1.442695, %v802_v54  ;;  %v1114_v0 = vmul.f32 %v3522_v58, %v3434_v40 }
  0xff   :  { %1620 = vst.msk [vmem:[%s4745_s5 + $0x10] sm:$0xf] %vm1615_vm1, %v2537_v48  ;;  %v2540_v30 = vpack.c.bf16 %v1302_v4, %v1302_v4  ;;  %v1300_v63 = vmul.f32 %v2938_v13, %v1108_v7  ;;  %v2940_v50 = vpop.eup %2939  ;;  %v881_v17 = vmul.f32 1.442695, %v800_v20  ;;  %v3618_v32 = vadd.f32 %v3361_v36, %v670_v24  ;;  %v3620_v40 = vpop.f32.mrf.mxu1 }
 0x100   :  { %v1179_v9 = vadd.f32 2.0, %v3591_v53  ;;  %v3609_v22 = vmul.f32 %v2936_v61, %v990_v2  ;;  %v3611_v55 = vpop.f32.mrf.mxu0  ;;  %v2942_v47 = vpop.eup %2941  ;;  %v988_v7 = vadd.f32 2.0, %v2940_v50  ;;  %2955 = vpow2.f32 %v885_v35 }
 0x101   :  { %1623 = vst.msk [vmem:[%s4745_s5 + $0x1c] sm:$0xf] %vm1615_vm1, %v2540_v30  ;;  %v2538_v21 = vpack.c.bf16 %v1300_v63, %v1300_v63  ;;  %v1305_v58 = vmul.f32 %v2942_v47, %v1113_v25  ;;  %v1112_v12 = vmul.f32 %v3540_v51, %v3444_v56  ;;  %v805_v13 = vmin.f32 %v3618_v32, 20.0  ;;  %v3637_v56 = vpop.f32.mrf.mxu1 }
 0x102   :  { %2957 = vrcp.f32 %v1179_v9  ;;  %v1182_v61 = vadd.f32 2.0, %v3609_v22  ;;  %v3625_v48 = vpop.f32.mrf.mxu0  ;;  %v3631_v54 = vmul.f32 %v2940_v50, %v988_v7  ;;  %v3635_v25 = vadd.f32 %v3361_v36, %v668_v49 }
 0x103   :  { %v2944_v4 = vpop.eup %2943  ;;  %1621 = vst.msk [vmem:[%s4745_s5 + $0x14] sm:$0xf] %vm1615_vm1, %v2538_v21  ;;  %2959 = vpow2.f32 %v881_v17  ;;  %v2543_v2 = vpack.c.bf16 %v1305_v58, %v1305_v58  ;;  %v671_v24 = vmul.f32 %v3516_v42, %v3356_v34  ;;  %v1117_v35 = vmul.f32 %v3548_v18, %v3455_v5  ;;  %v3646_v17 = vpop.f32.mrf.mxu1 }
 0x104   :  { %v2946_v51 = vpop.eup %2945  ;;  %v1303_v20 = vmul.f32 %v2944_v4, %v1111_v39  ;;  %2961 = vrcp.f32 %v1182_v61  ;;  %v3641_v30 = vpop.f32.mrf.mxu0  ;;  %v1180_v50 = vadd.f32 2.0, %v3631_v54  ;;  %v891_v49 = vmul.f32 1.442695, %v805_v13 }
 0x105   :  { %v2948_v63 = vpop.eup %2947  ;;  %v993_v9 = vadd.f32 2.0, %v2946_v51  ;;  %1626 = vst.msk [vmem:[%s4745_s5 + $0x28] sm:$0xf] %vm1615_vm1, %v2543_v2  ;;  %v803_v42 = vmin.f32 %v3635_v25, 20.0  ;;  %v3654_v21 = vadd.f32 %v3361_v36, %v671_v24  ;;  %v669_v18 = vmul.f32 %v3356_v34, %v3524_v59  ;;  %v3664_v61 = vpop.f32.mrf.mxu1 }
 0x106   :  { %v2541_v39 = vpack.c.bf16 %v1303_v20, %v1303_v20  ;;  %v1306_v47 = vmul.f32 %v2948_v63, %v1114_v0  ;;  %v3656_v7 = vpop.f32.mrf.mxu0  ;;  %2963 = vrcp.f32 %v1180_v50  ;;  %v674_v58 = vmul.f32 %v3534_v11, %v3356_v34 }
 0x107   :  { %v3658_v5 = vmul.f32 %v2946_v51, %v993_v9  ;;  %v2950_v4 = vpop.eup %2949  ;;  %2965 = vpow2.f32 %v891_v49  ;;  %v887_v13 = vmul.f32 1.442695, %v803_v42  ;;  %v806_v51 = vmin.f32 %v3654_v21, 20.0  ;;  %v3677_v63 = vpop.f32.mrf.mxu1 }
 0x108   :  { %1624 = vst.msk [vmem:[%s4745_s5 + $0x20] sm:$0xf] %vm1615_vm1, %v2541_v39  ;;  %v2544_v0 = vpack.c.bf16 %v1306_v47, %v1306_v47  ;;  %v1304_v20 = vmul.f32 %v2950_v4, %v1112_v12  ;;  %v1115_v59 = vmul.f32 %v3591_v53, %v3468_v27  ;;  %v3675_v24 = vadd.f32 %v3361_v36, %v669_v18  ;;  %v3686_v27 = vpop.f32.mrf.mxu0 }
 0x109   :  { %v2952_v2 = vpop.eup %2951  ;;  %v1185_v11 = vadd.f32 2.0, %v3658_v5  ;;  %4746 = vst [vmem:[#allocation2_spill] sm:$0xff] %v3677_v63  ;;  %2967 = vpow2.f32 %v887_v13  ;;  %v893_v49 = vmul.f32 1.442695, %v806_v51  ;;  %v3684_v12 = vadd.f32 %v3361_v36, %v674_v58 }
 0x10a   :  { %v2954_v50 = vpop.eup %2953  ;;  %1627 = vst.msk [vmem:[%s4745_s5 + $0x2c] sm:$0xf] %vm1615_vm1, %v2544_v0  ;;  %v1309_v9 = vmul.f32 %v2952_v2, %v1117_v35  ;;  %v2542_v53 = vpack.c.bf16 %v1304_v20, %v1304_v20  ;;  %v804_v47 = vmin.f32 %v3675_v24, 20.0  ;;  %v672_v4 = vmul.f32 %v3356_v34, %v3552_v23  ;;  %v3692_v35 = vpop.f32.mrf.mxu1 }
 0x10b   :  { %2969 = vrcp.f32 %v1185_v11  ;;  %v991_v39 = vadd.f32 2.0, %v2954_v50  ;;  %v809_v18 = vmin.f32 %v3684_v12, 20.0  ;;  %4747 = vst [vmem:[#allocation3_spill] sm:$0xff] %v3692_v35  ;;  %v675_v13 = vmul.f32 %v3568_v38, %v3356_v34  ;;  %v3715_v38 = vpop.f32.mrf.mxu0 }
 0x10c   :  { %v2547_v42 = vpack.c.bf16 %v1309_v9, %v1309_v9  ;;  %2971 = vpow2.f32 %v893_v49  ;;  %1625 = vst.msk [vmem:[%s4745_s5 + $0x24] sm:$0xf] %vm1615_vm1, %v2542_v53  ;;  %v889_v0 = vmul.f32 1.442695, %v804_v47  ;;  %v673_v51 = vmul.f32 %v3356_v34, %v3582_v26 }
 0x10d   :  { %v3698_v58 = vmul.f32 %v2954_v50, %v991_v39  ;;  %v2956_v2 = vpop.eup %2955  ;;  %v1118_v23 = vmul.f32 %v3609_v22, %v3476_v44  ;;  %v899_v20 = vmul.f32 1.442695, %v809_v18  ;;  %v3711_v11 = vadd.f32 %v3361_v36, %v672_v4 }
 0x10e   :  { %1630 = vst.msk [vmem:[%s4745_s5 + $0x38] sm:$0xf] %vm1615_vm1, %v2547_v42  ;;  %v2607_v50 = vpack.c.bf16 %v3451_v1, %v3451_v1  ;;  %v994_v49 = vadd.f32 2.0, %v2956_v2  ;;  %2973 = vpow2.f32 %v889_v0  ;;  %v678_v53 = vmul.f32 %v3596_v52, %v3356_v34  ;;  %v3728_v1 = vpop.f32.mrf.mxu1 }
 0x10f   :  { %v2958_v9 = vpop.eup %2957  ;;  %v1183_v26 = vadd.f32 2.0, %v3698_v58  ;;  %2975 = vpow2.f32 %v899_v20  ;;  %v807_v44 = vmin.f32 %v3711_v11, 20.0  ;;  %v3722_v22 = vadd.f32 %v3361_v36, %v675_v13  ;;  %4748 = vst [vmem:[#allocation4_spill] sm:$0xff] %v3728_v1 }
 0x110   :  { %v2960_v39 = vpop.eup %2959  ;;  %v1307_v47 = vmul.f32 %v2958_v9, %v1115_v59  ;;  %2243 = vst.msk [vmem:[%s4744_s6 + $0x28] sm:$0xf] %vm1615_vm1, %v2607_v50  ;;  %v1058_v18 = vmul.f32 %v2956_v2, %v994_v49  ;;  %v3731_v52 = vadd.f32 %v3361_v36, %v673_v51  ;;  %v3734_v9 = vpop.f32.mrf.mxu0  ;;  %v1116_v35 = vmul.f32 %v3631_v54, %v3489_v43 }
 0x111   :  { %v2962_v42 = vpop.eup %2961  ;;  %2977 = vrcp.f32 %v1183_v26  ;;  %v992_v4 = vadd.f32 2.0, %v2960_v39  ;;  %v895_v20 = vmul.f32 1.442695, %v807_v44  ;;  %v810_v13 = vmin.f32 %v3722_v22, 20.0  ;;  %v3746_v49 = vpop.f32.mrf.mxu1 }
 0x112   :  { %v2545_v59 = vpack.c.bf16 %v1307_v47, %v1307_v47  ;;  %v1310_v0 = vmul.f32 %v2962_v42, %v1118_v23  ;;  %v1186_v50 = vadd.f32 2.0, %v1058_v18  ;;  %v808_v1 = vmin.f32 %v3731_v52, 20.0 }
 0x113   :  { %v1056_v63 = vmul.f32 %v2960_v39, %v992_v4  ;;  %v2964_v26 = vpop.eup %2963  ;;  %2979 = vpow2.f32 %v895_v20  ;;  %v901_v2 = vmul.f32 1.442695, %v810_v13  ;;  %v3744_v23 = vadd.f32 %v3361_v36, %v678_v53  ;;  %v3755_v4 = vpop.f32.mrf.mxu0 }
 0x114   :  { %1628 = vst.msk [vmem:[%s4745_s5 + $0x30] sm:$0xf] %vm1615_vm1, %v2545_v59  ;;  %v2548_v51 = vpack.c.bf16 %v1310_v0, %v1310_v0  ;;  %v2966_v47 = vpop.eup %2965  ;;  %v1308_v43 = vmul.f32 %v2964_v26, %v1116_v35  ;;  %v1121_v54 = vmul.f32 %v3658_v5, %v3511_v60  ;;  %2981 = vrcp.f32 %v1186_v50  ;;  %v3761_v26 = vpop.f32.mrf.mxu1 }
 0x115   :  { %v1184_v39 = vadd.f32 2.0, %v1056_v63  ;;  %v997_v44 = vadd.f32 2.0, %v2966_v47  ;;  %2983 = vpow2.f32 %v901_v2  ;;  %v897_v42 = vmul.f32 1.442695, %v808_v1 }
 0x116   :  { %1631 = vst.msk [vmem:[%s4745_s5 + $0x3c] sm:$0xf] %vm1615_vm1, %v2548_v51  ;;  %v813_v53 = vmin.f32 %v3744_v23, 20.0  ;;  %v2968_v59 = vpop.eup %2967  ;;  %v2546_v0 = vpack.c.bf16 %v1308_v43, %v1308_v43  ;;  %v2605_v60 = vpack.c.bf16 %v3461_v10, %v3461_v10  ;;  %v676_v5 = vmul.f32 %v3356_v34, %v3611_v55 }
 0x117   :  { %2985 = vrcp.f32 %v1184_v39  ;;  %v1061_v20 = vmul.f32 %v2966_v47, %v997_v44  ;;  %v995_v13 = vadd.f32 2.0, %v2968_v59  ;;  %v2608_v55 = vpack.c.bf16 %v3465_v19, %v3465_v19  ;;  %v3780_v44 = vpop.f32.mrf.mxu0 }
 0x118   :  { %v2970_v35 = vpop.eup %2969  ;;  %2987 = vpow2.f32 %v897_v42  ;;  %v907_v50 = vmul.f32 1.442695, %v813_v53  ;;  %1629 = vst.msk [vmem:[%s4745_s5 + $0x34] sm:$0xf] %vm1615_vm1, %v2546_v0  ;;  %2241 = vst.msk [vmem:[%s4744_s6 + $0x20] sm:$0xf] %vm1615_vm1, %v2605_v60  ;;  %v3772_v10 = vadd.f32 %v3361_v36, %v676_v5  ;;  %v679_v2 = vmul.f32 %v3625_v48, %v3356_v34  ;;  %v3791_v0 = vpop.f32.mrf.mxu1 }
 0x119   :  { %v2972_v1 = vpop.eup %2971  ;;  %v1313_v51 = vmul.f32 %v2970_v35, %v1121_v54  ;;  %v1119_v47 = vmul.f32 %v3698_v58, %v3543_v16  ;;  %v1189_v43 = vadd.f32 2.0, %v1061_v20  ;;  %v1059_v39 = vmul.f32 %v2968_v59, %v995_v13  ;;  %2244 = vst.msk [vmem:[%s4744_s6 + $0x2c] sm:$0xf] %vm1615_vm1, %v2608_v55  ;;  %v3801_v55 = vpop.f32.mrf.mxu0 }
 0x11a   :  { %v998_v54 = vadd.f32 2.0, %v2972_v1  ;;  %2989 = vpow2.f32 %v907_v50  ;;  %v811_v53 = vmin.f32 %v3772_v10, 20.0  ;;  %v3788_v19 = vadd.f32 %v3361_v36, %v679_v2 }
 0x11b   :  { %v2551_v42 = vpack.c.bf16 %v1313_v51, %v1313_v51  ;;  %v2974_v48 = vpop.eup %2973  ;;  %v1122_v16 = vmul.f32 %v1058_v18, %v3571_v37  ;;  %2991 = vrcp.f32 %v1189_v43  ;;  %v1187_v58 = vadd.f32 2.0, %v1059_v39 }
 0x11c   :  { %v1062_v59 = vmul.f32 %v2972_v1, %v998_v54  ;;  %v2976_v60 = vpop.eup %2975  ;;  %v996_v5 = vadd.f32 2.0, %v2974_v48  ;;  %v903_v35 = vmul.f32 1.442695, %v811_v53  ;;  %v814_v13 = vmin.f32 %v3788_v19, 20.0 }
 0x11d   :  { %1634 = vst.msk [vmem:[%s4745_s5 + $0x48] sm:$0xf] %vm1615_vm1, %v2551_v42  ;;  %v2606_v50 = vpack.c.bf16 %v3471_v29, %v3471_v29  ;;  %v1120_v37 = vmul.f32 %v1056_v63, %v3580_v33  ;;  %2993 = vrcp.f32 %v1187_v58  ;;  %v1001_v1 = vadd.f32 2.0, %v2976_v60  ;;  %v3811_v63 = vpop.f32.mrf.mxu1 }
 0x11e   :  { %v2978_v51 = vpop.eup %2977  ;;  %v1190_v18 = vadd.f32 2.0, %v1062_v59  ;;  %v1060_v43 = vmul.f32 %v2974_v48, %v996_v5  ;;  %2995 = vpow2.f32 %v903_v35  ;;  %v909_v54 = vmul.f32 1.442695, %v814_v13 }
 0x11f   :  { %v1311_v2 = vmul.f32 %v2978_v51, %v1119_v47  ;;  %2242 = vst.msk [vmem:[%s4744_s6 + $0x24] sm:$0xf] %vm1615_vm1, %v2606_v50  ;;  %v1065_v42 = vmul.f32 %v2976_v60, %v1001_v1  ;;  %v677_v29 = vmul.f32 %v3356_v34, %v3641_v30  ;;  %v2611_v33 = vpack.c.bf16 %v3478_v45, %v3478_v45  ;;  %v3822_v45 = vpop.f32.mrf.mxu0 }
 0x120   :  { %2997 = vrcp.f32 %v1190_v18  ;;  %v2980_v53 = vpop.eup %2979  ;;  %v1125_v48 = vmul.f32 %v1061_v20, %v3618_v32  ;;  %v1188_v58 = vadd.f32 2.0, %v1060_v43  ;;  %v1123_v35 = vmul.f32 %v1059_v39, %v3635_v25 }
 0x121   :  { %v2549_v47 = vpack.c.bf16 %v1311_v2, %v1311_v2  ;;  %2999 = vpow2.f32 %v909_v54  ;;  %v2982_v5 = vpop.eup %2981  ;;  %v1193_v13 = vadd.f32 2.0, %v1065_v42  ;;  %v999_v50 = vadd.f32 2.0, %v2980_v53  ;;  %2247 = vst.msk [vmem:[%s4744_s6 + $0x38] sm:$0xf] %vm1615_vm1, %v2611_v33  ;;  %v3833_v2 = vpop.f32.mrf.mxu1 }
 0x122   :  { %v3816_v60 = vadd.f32 %v3361_v36, %v677_v29  ;;  %v2984_v30 = vpop.eup %2983  ;;  %v1314_v32 = vmul.f32 %v2982_v5, %v1122_v16  ;;  %3001 = vrcp.f32 %v1188_v58  ;;  %v682_v25 = vmul.f32 %v3656_v7, %v3356_v34  ;;  %v3847_v5 = vpop.f32.mrf.mxu0 }
 0x123   :  { %1632 = vst.msk [vmem:[%s4745_s5 + $0x40] sm:$0xf] %vm1615_vm1, %v2549_v47  ;;  %v2609_v20 = vpack.c.bf16 %v3485_v57, %v3485_v57  ;;  %3003 = vrcp.f32 %v1193_v13  ;;  %v1063_v51 = vmul.f32 %v2980_v53, %v999_v50  ;;  %v1002_v18 = vadd.f32 2.0, %v2984_v30 }
 0x124   :  { %v2986_v39 = vpop.eup %2985  ;;  %v812_v1 = vmin.f32 %v3816_v60, 20.0  ;;  %v2552_v29 = vpack.c.bf16 %v1314_v32, %v1314_v32  ;;  %v3836_v16 = vadd.f32 %v3361_v36, %v682_v25  ;;  %v680_v57 = vmul.f32 %v3356_v34, %v3686_v27 }
 0x125   :  { %v2988_v54 = vpop.eup %2987  ;;  %v1312_v33 = vmul.f32 %v2986_v39, %v1120_v37  ;;  %2245 = vst.msk [vmem:[%s4744_s6 + $0x30] sm:$0xf] %vm1615_vm1, %v2609_v20  ;;  %v1126_v7 = vmul.f32 %v1062_v59, %v3654_v21  ;;  %v1191_v53 = vadd.f32 2.0, %v1063_v51  ;;  %v3845_v47 = vmul.f32 %v2984_v30, %v1002_v18  ;;  %v3861_v30 = vpop.f32.mrf.mxu1 }
 0x126   :  { %v1000_v58 = vadd.f32 2.0, %v2988_v54  ;;  %1635 = vst.msk [vmem:[%s4745_s5 + $0x4c] sm:$0xf] %vm1615_vm1, %v2552_v29  ;;  %v905_v13 = vmul.f32 1.442695, %v812_v1  ;;  %v817_v50 = vmin.f32 %v3836_v16, 20.0  ;;  %v3855_v32 = vadd.f32 %v3361_v36, %v680_v57  ;;  %v3870_v1 = vpop.f32.mrf.mxu0 }
 0x127   :  { %v2550_v37 = vpack.c.bf16 %v1312_v33, %v1312_v33  ;;  %v2990_v34 = vpop.eup %2989  ;;  %v1124_v21 = vmul.f32 %v1060_v43, %v3675_v24  ;;  %3005 = vrcp.f32 %v1191_v53  ;;  %v1194_v27 = vadd.f32 2.0, %v3845_v47 }
 0x128   :  { %v3859_v59 = vmul.f32 %v2988_v54, %v1000_v58  ;;  %v2992_v25 = vpop.eup %2991  ;;  %v1005_v20 = vadd.f32 2.0, %v2990_v34  ;;  %3007 = vpow2.f32 %v905_v13  ;;  %v915_v36 = vmul.f32 1.442695, %v817_v50 }
 0x129   :  { %1633 = vst.msk [vmem:[%s4745_s5 + $0x44] sm:$0xf] %vm1615_vm1, %v2550_v37  ;;  %v815_v39 = vmin.f32 %v3855_v32, 20.0  ;;  %v1317_v18 = vmul.f32 %v2992_v25, %v1125_v48  ;;  %v1129_v24 = vmul.f32 %v1065_v42, %v3684_v12  ;;  %3009 = vrcp.f32 %v1194_v27  ;;  %v3879_v12 = vld [vmem:[%s4742_s2] ss:$0 sm:$0xff]  ;;  %v3883_v48 = vpop.f32.mrf.mxu1 }
 0x12a   :  { %v1192_v43 = vadd.f32 2.0, %v3859_v59  ;;  %v2994_v54 = vpop.eup %2993  ;;  %v3872_v29 = vmul.f32 %v2990_v34, %v1005_v20  ;;  %3011 = vpow2.f32 %v915_v36  ;;  %v2612_v57 = vpack.c.bf16 %v3496_v3, %v3496_v3  ;;  %v3905_v20 = vpop.f32.mrf.mxu0 }
 0x12b   :  { %v911_v33 = vmul.f32 1.442695, %v815_v39  ;;  %v2996_v53 = vpop.eup %2995  ;;  %v2555_v58 = vpack.c.bf16 %v1317_v18, %v1317_v18  ;;  %v1315_v37 = vmul.f32 %v2994_v54, %v1123_v35  ;;  %v683_v42 = vmul.f32 %v3879_v12, %v3715_v38 }
 0x12c   :  { %3013 = vrcp.f32 %v1192_v43  ;;  %v1127_v50 = vmul.f32 %v1063_v51, %v3711_v11  ;;  %v1197_v34 = vadd.f32 2.0, %v3872_v29  ;;  %v1003_v3 = vadd.f32 2.0, %v2996_v53  ;;  %2248 = vst.msk [vmem:[%s4744_s6 + $0x3c] sm:$0xf] %vm1615_vm1, %v2612_v57  ;;  %v3898_v11 = vld [vmem:[%s4743_s3] ss:$0 sm:$0xff] }
 0x12d   :  { %v2998_v13 = vpop.eup %2997  ;;  %3015 = vpow2.f32 %v911_v33  ;;  %1638 = vst.msk [vmem:[%s4745_s5 + $0x58] sm:$0xf] %vm1615_vm1, %v2555_v58  ;;  %v2553_v38 = vpack.c.bf16 %v1315_v37, %v1315_v37  ;;  %v3901_v51 = vadd.f32 %v3898_v11, %v683_v42  ;;  %v2610_v25 = vpack.c.bf16 %v3505_v14, %v3505_v14  ;;  %v3924_v33 = vpop.f32.mrf.mxu1 }
 0x12e   :  { %v3000_v35 = vpop.eup %2999  ;;  %v1318_v27 = vmul.f32 %v2998_v13, %v1126_v7  ;;  %3017 = vrcp.f32 %v1197_v34  ;;  %v3907_v36 = vmul.f32 %v2996_v53, %v1003_v3  ;;  %v681_v7 = vmul.f32 %v3879_v12, %v3734_v9 }
 0x12f   :  { %v1006_v39 = vadd.f32 2.0, %v3000_v35  ;;  %v3002_v18 = vpop.eup %3001  ;;  %1636 = vst.msk [vmem:[%s4745_s5 + $0x50] sm:$0xf] %vm1615_vm1, %v2553_v38  ;;  %v818_v54 = vmin.f32 %v3901_v51, 20.0  ;;  %2246 = vst.msk [vmem:[%s4744_s6 + $0x34] sm:$0xf] %vm1615_vm1, %v2610_v25  ;;  %v2615_v14 = vpack.c.bf16 %v3513_v28, %v3513_v28  ;;  %v686_v9 = vmul.f32 %v3879_v12, %v3755_v4 }
 0x130   :  { %v2556_v43 = vpack.c.bf16 %v1318_v27, %v1318_v27  ;;  %v3004_v57 = vpop.eup %3003  ;;  %v1316_v53 = vmul.f32 %v3002_v18, %v1124_v21  ;;  %v1130_v58 = vmul.f32 %v3845_v47, %v3722_v22  ;;  %v1195_v37 = vadd.f32 2.0, %v3907_v36  ;;  %v3945_v47 = vpop.f32.mrf.mxu0 }
 0x131   :  { %v3929_v42 = vmul.f32 %v3000_v35, %v1006_v39  ;;  %v1321_v28 = vmul.f32 %v3004_v57, %v1129_v24  ;;  %v917_v13 = vmul.f32 1.442695, %v818_v54  ;;  %v3936_v4 = vadd.f32 %v3898_v11, %v681_v7  ;;  %2251 = vst.msk [vmem:[%s4744_s6 + $0x48] sm:$0xf] %vm1615_vm1, %v2615_v14  ;;  %v3952_v27 = vpop.f32.mrf.mxu1 }
 0x132   :  { %1639 = vst.msk [vmem:[%s4745_s5 + $0x5c] sm:$0xf] %vm1615_vm1, %v2556_v43  ;;  %v3943_v22 = vadd.f32 %v3898_v11, %v686_v9  ;;  %v2554_v21 = vpack.c.bf16 %v1316_v53, %v1316_v53  ;;  %v1128_v34 = vmul.f32 %v3859_v59, %v3731_v52  ;;  %3019 = vrcp.f32 %v1195_v37  ;;  %v3970_v9 = vpop.f32.mrf.mxu0 }
 0x133   :  { %v1198_v24 = vadd.f32 2.0, %v3929_v42  ;;  %v2559_v3 = vpack.c.bf16 %v1321_v28, %v1321_v28  ;;  %3021 = vpow2.f32 %v917_v13  ;;  %v816_v35 = vmin.f32 %v3936_v4, 20.0  ;;  %v3990_v13 = vpop.f32.mrf.mxu1 }
 0x134   :  { %v821_v38 = vmin.f32 %v3943_v22, 20.0  ;;  %v3006_v25 = vpop.eup %3005  ;;  %1637 = vst.msk [vmem:[%s4745_s5 + $0x54] sm:$0xf] %vm1615_vm1, %v2554_v21  ;;  %v2613_v52 = vpack.c.bf16 %v3519_v31, %v3519_v31  ;;  %v684_v59 = vmul.f32 %v3879_v12, %v3780_v44  ;;  %v2616_v39 = vpack.c.bf16 %v3530_v6, %v3530_v6 }
 0x135   :  { %3023 = vrcp.f32 %v1198_v24  ;;  %v3008_v7 = vpop.eup %3007  ;;  %1642 = vst.msk [vmem:[%s4745_s5 + $0x68] sm:$0xf] %vm1615_vm1, %v2559_v3  ;;  %v1319_v18 = vmul.f32 %v3006_v25, %v1127_v50  ;;  %v913_v43 = vmul.f32 1.442695, %v816_v35  ;;  %v687_v14 = vmul.f32 %v3879_v12, %v3801_v55 }
 0x136   :  { %v923_v54 = vmul.f32 1.442695, %v821_v38  ;;  %v3010_v31 = vpop.eup %3009  ;;  %v1004_v57 = vadd.f32 2.0, %v3008_v7  ;;  %2249 = vst.msk [vmem:[%s4744_s6 + $0x40] sm:$0xf] %vm1615_vm1, %v2613_v52  ;;  %v3977_v6 = vadd.f32 %v3898_v11, %v684_v59  ;;  %v2614_v44 = vpack.c.bf16 %v3545_v15, %v3545_v15  ;;  %v4007_v52 = vpop.f32.mrf.mxu0 }
 0x137   :  { %2252 = vst.msk [vmem:[%s4744_s6 + $0x4c] sm:$0xf] %vm1615_vm1, %v2616_v39  ;;  %v685_v55 = vmul.f32 %v3879_v12, %v3822_v45  ;;  %v3012_v50 = vpop.eup %3011  ;;  %v2557_v53 = vpack.c.bf16 %v1319_v18, %v1319_v18  ;;  %v1322_v37 = vmul.f32 %v3010_v31, %v1130_v58  ;;  %3025 = vpow2.f32 %v913_v43 }
 0x138   :  { %v3988_v28 = vadd.f32 %v3898_v11, %v687_v14  ;;  %v3992_v24 = vmul.f32 %v3008_v7, %v1004_v57  ;;  %v1009_v3 = vadd.f32 2.0, %v3012_v50  ;;  %3027 = vpow2.f32 %v923_v54  ;;  %2250 = vst.msk [vmem:[%s4744_s6 + $0x44] sm:$0xf] %vm1615_vm1, %v2614_v44  ;;  %v4019_v57 = vpop.f32.mrf.mxu1 }
 0x139   :  { %v3014_v21 = vpop.eup %3013  ;;  %v819_v35 = vmin.f32 %v3977_v6, 20.0  ;;  %1640 = vst.msk [vmem:[%s4745_s5 + $0x60] sm:$0xf] %vm1615_vm1, %v2557_v53  ;;  %v2560_v45 = vpack.c.bf16 %v1322_v37, %v1322_v37  ;;  %v4005_v25 = vadd.f32 %v3898_v11, %v685_v55  ;;  %v1133_v59 = vmul.f32 %v3872_v29, %v3744_v23  ;;  %v4032_v37 = vpop.f32.mrf.mxu0 }
 0x13a   :  { %v3016_v15 = vpop.eup %3015  ;;  %v1320_v58 = vmul.f32 %v3014_v21, %v1128_v34  ;;  %v822_v38 = vmin.f32 %v3988_v28, 20.0  ;;  %v1196_v39 = vadd.f32 2.0, %v3992_v24  ;;  %v4012_v7 = vmul.f32 %v3012_v50, %v1009_v3 }
 0x13b   :  { %v1007_v18 = vadd.f32 2.0, %v3016_v15  ;;  %v3018_v43 = vpop.eup %3017  ;;  %1643 = vst.msk [vmem:[%s4745_s5 + $0x6c] sm:$0xf] %vm1615_vm1, %v2560_v45  ;;  %v919_v54 = vmul.f32 1.442695, %v819_v35  ;;  %v820_v31 = vmin.f32 %v4005_v25, 20.0  ;;  %v1131_v23 = vmul.f32 %v3907_v36, %v3772_v10  ;;  %v4047_v45 = vpop.f32.mrf.mxu1 }
 0x13c   :  { %v2558_v34 = vpack.c.bf16 %v1320_v58, %v1320_v58  ;;  %v925_v14 = vmul.f32 1.442695, %v822_v38  ;;  %v1325_v44 = vmul.f32 %v3018_v43, %v1133_v59  ;;  %3029 = vrcp.f32 %v1196_v39  ;;  %v4067_v39 = vpop.f32.mrf.mxu0 }
 0x13d   :  { %v1201_v29 = vadd.f32 2.0, %v4012_v7  ;;  %v4028_v55 = vmul.f32 %v3016_v15, %v1007_v18  ;;  %3031 = vpow2.f32 %v919_v54  ;;  %v921_v50 = vmul.f32 1.442695, %v820_v31 }
 0x13e   :  { %1641 = vst.msk [vmem:[%s4745_s5 + $0x64] sm:$0xf] %vm1615_vm1, %v2558_v34  ;;  %v2619_v53 = vpack.c.bf16 %v3563_v41, %v3563_v41  ;;  %v2563_v21 = vpack.c.bf16 %v1325_v44, %v1325_v44  ;;  %v690_v10 = vmul.f32 %v3879_v12, %v3847_v5  ;;  %v2617_v36 = vpack.c.bf16 %v3573_v62, %v3573_v62  ;;  %v4084_v44 = vpop.f32.mrf.mxu1 }
 0x13f   :  { %3033 = vrcp.f32 %v1201_v29  ;;  %v3020_v3 = vpop.eup %3019  ;;  %v1134_v35 = vmul.f32 %v3929_v42, %v3788_v19  ;;  %v1199_v15 = vadd.f32 2.0, %v4028_v55  ;;  %v688_v41 = vmul.f32 %v3879_v12, %v3870_v1 }
 0x140   :  { %3035 = vpow2.f32 %v925_v14  ;;  %2255 = vst.msk [vmem:[%s4744_s6 + $0x58] sm:$0xf] %vm1615_vm1, %v2619_v53  ;;  %v3022_v5 = vpop.eup %3021  ;;  %1646 = vst.msk [vmem:[%s4745_s5 + $0x78] sm:$0xf] %vm1615_vm1, %v2563_v21  ;;  %v1323_v62 = vmul.f32 %v3020_v3, %v1131_v23  ;;  %v4054_v19 = vadd.f32 %v3898_v11, %v690_v10  ;;  %v2620_v1 = vpack.c.bf16 %v3585_v8, %v3585_v8 }
 0x141   :  { %3037 = vpow2.f32 %v921_v50  ;;  %2253 = vst.msk [vmem:[%s4744_s6 + $0x50] sm:$0xf] %vm1615_vm1, %v2617_v36  ;;  %v1010_v58 = vadd.f32 2.0, %v3022_v5  ;;  %v4063_v38 = vadd.f32 %v3898_v11, %v688_v41  ;;  %v691_v59 = vmul.f32 %v3879_v12, %v3905_v20 }
 0x142   :  { %v3024_v42 = vpop.eup %3023  ;;  %3039 = vrcp.f32 %v1199_v15  ;;  %v2561_v18 = vpack.c.bf16 %v1323_v62, %v1323_v62  ;;  %v825_v34 = vmin.f32 %v4054_v19, 20.0  ;;  %2256 = vst.msk [vmem:[%s4744_s6 + $0x5c] sm:$0xf] %vm1615_vm1, %v2620_v1  ;;  %v2618_v8 = vpack.c.bf16 %v3604_v46, %v3604_v46 }
 0x143   :  { %v1326_v43 = vmul.f32 %v3024_v42, %v1134_v35  ;;  %v4076_v54 = vmul.f32 %v3022_v5, %v1010_v58  ;;  %v823_v14 = vmin.f32 %v4063_v38, 20.0  ;;  %v4080_v20 = vadd.f32 %v3898_v11, %v691_v59  ;;  %v4101_v35 = vpop.f32.mrf.mxu0  ;;  %v4120_v5 = vpop.f32.mrf.mxu1 }
 0x144   :  { %v689_v31 = vmul.f32 %v3879_v12, %v3945_v47  ;;  %v3026_v23 = vpop.eup %3025  ;;  %1644 = vst.msk [vmem:[%s4745_s5 + $0x70] sm:$0xf] %vm1615_vm1, %v2561_v18  ;;  %v931_v46 = vmul.f32 1.442695, %v825_v34  ;;  %2254 = vst.msk [vmem:[%s4744_s6 + $0x54] sm:$0xf] %vm1615_vm1, %v2618_v8  ;;  %v2623_v50 = vpack.c.bf16 %v3620_v40, %v3620_v40  ;;  %v694_v47 = vmul.f32 %v3879_v12, %v3970_v9 }
 0x145   :  { %v2564_v29 = vpack.c.bf16 %v1326_v43, %v1326_v43  ;;  %v3028_v53 = vpop.eup %3027  ;;  %v1132_v21 = vmul.f32 %v3992_v24, %v3816_v60  ;;  %v1202_v10 = vadd.f32 2.0, %v4076_v54  ;;  %v1008_v36 = vadd.f32 2.0, %v3026_v23  ;;  %v4132_v34 = vpop.f32.mrf.mxu0 }
 0x146   :  { %v927_v3 = vmul.f32 1.442695, %v823_v14  ;;  %v1013_v15 = vadd.f32 2.0, %v3028_v53  ;;  %3041 = vpow2.f32 %v931_v46  ;;  %v826_v40 = vmin.f32 %v4080_v20, 20.0  ;;  %2259 = vst.msk [vmem:[%s4744_s6 + $0x68] sm:$0xf] %vm1615_vm1, %v2623_v50  ;;  %v4136_v50 = vpop.f32.mrf.mxu1 }
 0x147   :  { %1647 = vst.msk [vmem:[%s4745_s5 + $0x7c] sm:$0xf] %vm1615_vm1, %v2564_v29  ;;  %v4109_v9 = vadd.f32 %v3898_v11, %v689_v31  ;;  %3043 = vrcp.f32 %v1202_v10  ;;  %v1072_v60 = vmul.f32 %v3026_v23, %v1008_v36  ;;  %v4116_v24 = vadd.f32 %v3898_v11, %v694_v47 }
 0x148   :  { %v2621_v41 = vpack.c.bf16 %v3637_v56, %v3637_v56  ;;  %v1077_v62 = vmul.f32 %v3028_v53, %v1013_v15  ;;  %3045 = vpow2.f32 %v927_v3  ;;  %v933_v1 = vmul.f32 1.442695, %v826_v40 }
 0x149   :  { %v824_v42 = vmin.f32 %v4109_v9, 20.0  ;;  %v3030_v58 = vpop.eup %3029  ;;  %v1137_v59 = vmul.f32 %v4012_v7, %v3836_v16  ;;  %v1200_v18 = vadd.f32 2.0, %v1072_v60  ;;  %v829_v43 = vmin.f32 %v4116_v24, 20.0 }
 0x14a   :  { %2257 = vst.msk [vmem:[%s4744_s6 + $0x60] sm:$0xf] %vm1615_vm1, %v2621_v41  ;;  %v692_v56 = vmul.f32 %v3879_v12, %v4007_v52  ;;  %v3032_v8 = vpop.eup %3031  ;;  %v1324_v14 = vmul.f32 %v3030_v58, %v1132_v21  ;;  %v1135_v31 = vmul.f32 %v4028_v55, %v3855_v32  ;;  %v1205_v23 = vadd.f32 2.0, %v1077_v62  ;;  %v4143_v55 = vpop.f32.mrf.mxu0 }
 0x14b   :  { %3047 = vpow2.f32 %v933_v1  ;;  %v1011_v7 = vadd.f32 2.0, %v3032_v8  ;;  %v929_v29 = vmul.f32 1.442695, %v824_v42  ;;  %v939_v46 = vmul.f32 1.442695, %v829_v43 }
 0x14c   :  { %v3034_v16 = vpop.eup %3033  ;;  %3049 = vrcp.f32 %v1200_v18  ;;  %v2562_v53 = vpack.c.bf16 %v1324_v14, %v1324_v14  ;;  %v4139_v52 = vadd.f32 %v3898_v11, %v692_v56  ;;  %v2624_v32 = vpack.c.bf16 %v3646_v17, %v3646_v17  ;;  %v4158_v17 = vpop.f32.mrf.mxu1 }
 0x14d   :  { %v3036_v47 = vpop.eup %3035  ;;  %v1329_v10 = vmul.f32 %v3034_v16, %v1137_v59  ;;  %3051 = vrcp.f32 %v1205_v23  ;;  %v1075_v36 = vmul.f32 %v3032_v8, %v1011_v7  ;;  %v1138_v58 = vmul.f32 %v4076_v54, %v3901_v51  ;;  %v4172_v23 = vpop.f32.mrf.mxu0 }
 0x14e   :  { %v3038_v21 = vpop.eup %3037  ;;  %v1014_v3 = vadd.f32 2.0, %v3036_v47  ;;  %3053 = vpow2.f32 %v929_v29  ;;  %1645 = vst.msk [vmem:[%s4745_s5 + $0x74] sm:$0xf] %vm1615_vm1, %v2562_v53  ;;  %v827_v1 = vmin.f32 %v4139_v52, 20.0  ;;  %2260 = vst.msk [vmem:[%s4744_s6 + $0x6c] sm:$0xf] %vm1615_vm1, %v2624_v32  ;;  %v695_v51 = vmul.f32 %v3879_v12, %v4032_v37 }
 0x14f   :  { %v3040_v15 = vpop.eup %3039  ;;  %v2567_v40 = vpack.c.bf16 %v1329_v10, %v1329_v10  ;;  %v1012_v41 = vadd.f32 2.0, %v3038_v21  ;;  %3055 = vpow2.f32 %v939_v46  ;;  %v1203_v59 = vadd.f32 2.0, %v1075_v36  ;;  %v4750_v10 = vld [vmem:[#allocation3_spill] sm:$0xff] }
 0x150   :  { %v1327_v42 = vmul.f32 %v3040_v15, %v1135_v31  ;;  %v4152_v18 = vmul.f32 %v3036_v47, %v1014_v3  ;;  %v935_v56 = vmul.f32 1.442695, %v827_v1  ;;  %v2622_v54 = vpack.c.bf16 %v3664_v61, %v3664_v61 }
 0x151   :  { %1650 = vst.msk [vmem:[%s4745_s5 + $0x88] sm:$0xf] %vm1615_vm1, %v2567_v40  ;;  %v4164_v43 = vmul.f32 %v3038_v21, %v1012_v41  ;;  %v1136_v14 = vmul.f32 %v1072_v60, %v3936_v4  ;;  %3057 = vrcp.f32 %v1203_v59  ;;  %v1141_v16 = vmul.f32 %v1077_v62, %v3943_v22  ;;  %v4749_v22 = vld [vmem:[#allocation2_spill] sm:$0xff]  ;;  %v4193_v62 = vpop.f32.mrf.mxu1  ;;  %v4210_v40 = vpop.f32.mrf.mxu0 }
 0x152   :  { %v2565_v8 = vpack.c.bf16 %v1327_v42, %v1327_v42  ;;  %v1206_v31 = vadd.f32 2.0, %v4152_v18  ;;  %3059 = vpow2.f32 %v935_v56  ;;  %v4177_v29 = vadd.f32 %v3898_v11, %v695_v51  ;;  %2258 = vst.msk [vmem:[%s4744_s6 + $0x64] sm:$0xf] %vm1615_vm1, %v2622_v54 }
 0x153   :  { %v1204_v7 = vadd.f32 2.0, %v4164_v43  ;;  %v3042_v61 = vpop.eup %3041  ;;  %v693_v4 = vmul.f32 %v3879_v12, %v4067_v39  ;;  %v2627_v37 = vpack.c.bf16 %v4749_v22, %v4749_v22  ;;  %v698_v60 = vmul.f32 %v3879_v12, %v4101_v35 }
 0x154   :  { %1648 = vst.msk [vmem:[%s4745_s5 + $0x80] sm:$0xf] %vm1615_vm1, %v2565_v8  ;;  %3061 = vrcp.f32 %v1206_v31  ;;  %v3044_v46 = vpop.eup %3043  ;;  %v1017_v47 = vadd.f32 2.0, %v3042_v61  ;;  %v830_v53 = vmin.f32 %v4177_v29, 20.0  ;;  %v2625_v21 = vpack.c.bf16 %v4750_v10, %v4750_v10  ;;  %v4221_v31 = vpop.f32.mrf.mxu1 }
 0x155   :  { %3063 = vrcp.f32 %v1204_v7  ;;  %v3046_v3 = vpop.eup %3045  ;;  %v1330_v32 = vmul.f32 %v3044_v46, %v1138_v58  ;;  %v4199_v39 = vadd.f32 %v3898_v11, %v693_v4  ;;  %2263 = vst.msk [vmem:[%s4744_s6 + $0x78] sm:$0xf] %vm1615_vm1, %v2627_v37  ;;  %v4206_v35 = vadd.f32 %v3898_v11, %v698_v60  ;;  %v4751_v58 = vld [vmem:[#allocation4_spill] sm:$0xff] }
 0x156   :  { %v696_v15 = vmul.f32 %v3879_v12, %v4132_v34  ;;  %v1081_v41 = vmul.f32 %v3042_v61, %v1017_v47  ;;  %v1015_v1 = vadd.f32 2.0, %v3046_v3  ;;  %v941_v42 = vmul.f32 1.442695, %v830_v53  ;;  %2261 = vst.msk [vmem:[%s4744_s6 + $0x70] sm:$0xf] %vm1615_vm1, %v2625_v21  ;;  %v4234_v47 = vpop.f32.mrf.mxu0 }
 0x157   :  { %v2628_v59 = vpack.c.bf16 %v4751_v58, %v4751_v58  ;;  %v2568_v51 = vpack.c.bf16 %v1330_v32, %v1330_v32  ;;  %v1139_v54 = vmul.f32 %v1075_v36, %v3977_v6  ;;  %v828_v8 = vmin.f32 %v4199_v39, 20.0 }
 0x158   :  { %v3048_v56 = vpop.eup %3047  ;;  %v833_v34 = vmin.f32 %v4206_v35, 20.0  ;;  %v1209_v61 = vadd.f32 2.0, %v1081_v41  ;;  %v1079_v4 = vmul.f32 %v3046_v3, %v1015_v1  ;;  %v4224_v37 = vadd.f32 %v3898_v11, %v696_v15 }
 0x159   :  { %v3050_v7 = vpop.eup %3049  ;;  %v1018_v22 = vadd.f32 2.0, %v3048_v56  ;;  %2264 = vst.msk [vmem:[%s4744_s6 + $0x7c] sm:$0xf] %vm1615_vm1, %v2628_v59  ;;  %1651 = vst.msk [vmem:[%s4745_s5 + $0x8c] sm:$0xf] %vm1615_vm1, %v2568_v51  ;;  %3065 = vpow2.f32 %v941_v42  ;;  %v1142_v21 = vmul.f32 %v4152_v18, %v3988_v28  ;;  %v4238_v59 = vpop.f32.mrf.mxu1  ;;  %v1140_v28 = vmul.f32 %v4164_v43, %v4005_v25 }
 0x15a   :  { %v3052_v60 = vpop.eup %3051  ;;  %v1328_v6 = vmul.f32 %v3050_v7, %v1136_v14  ;;  %v937_v36 = vmul.f32 1.442695, %v828_v8  ;;  %v947_v46 = vmul.f32 1.442695, %v833_v34  ;;  %3067 = vrcp.f32 %v1209_v61 }
 0x15b   :  { %v3054_v53 = vpop.eup %3053  ;;  %v1333_v10 = vmul.f32 %v3052_v60, %v1141_v16  ;;  %v1207_v3 = vadd.f32 2.0, %v1079_v4  ;;  %v1082_v1 = vmul.f32 %v3048_v56, %v1018_v22  ;;  %v831_v51 = vmin.f32 %v4224_v37, 20.0  ;;  %v2784_v56 = vpop.f32.mrf.mxu0 }
 0x15c   :  { %v3056_v32 = vpop.eup %3055  ;;  %v2566_v15 = vpack.c.bf16 %v1328_v6, %v1328_v6  ;;  %v1016_v58 = vadd.f32 2.0, %v3054_v53  ;;  %3069 = vpow2.f32 %v937_v36  ;;  %v699_v61 = vmul.f32 %v3879_v12, %v4143_v55  ;;  %v4261_v36 = vpop.f32.mrf.mxu1 }
 0x15d   :  { %v2571_v14 = vpack.c.bf16 %v1333_v10, %v1333_v10  ;;  %3071 = vrcp.f32 %v1207_v3  ;;  %v1021_v42 = vadd.f32 2.0, %v3056_v32  ;;  %v1210_v18 = vadd.f32 2.0, %v1082_v1 }
 0x15e   :  { %1649 = vst.msk [vmem:[%s4745_s5 + $0x84] sm:$0xf] %vm1615_vm1, %v2566_v15  ;;  %v4247_v16 = vmul.f32 %v3054_v53, %v1016_v58  ;;  %3073 = vpow2.f32 %v947_v46  ;;  %v3058_v8 = vpop.eup %3057  ;;  %v943_v7 = vmul.f32 1.442695, %v831_v51  ;;  %v2626_v25 = vpack.c.bf16 %v3746_v49, %v3746_v49 }
 0x15f   :  { %1654 = vst.msk [vmem:[%s4745_s5 + $0x98] sm:$0xf] %vm1615_vm1, %v2571_v14  ;;  %v4253_v34 = vmul.f32 %v3056_v32, %v1021_v42  ;;  %v3060_v43 = vpop.eup %3059  ;;  %v1331_v22 = vmul.f32 %v3058_v8, %v1139_v54  ;;  %v1145_v60 = vmul.f32 %v1081_v41, %v4054_v19  ;;  %3075 = vrcp.f32 %v1210_v18  ;;  %v4272_v54 = vpop.f32.mrf.mxu0 }
 0x160   :  { %v1208_v6 = vadd.f32 2.0, %v4247_v16  ;;  %v1143_v53 = vmul.f32 %v1079_v4, %v4063_v38  ;;  %v1019_v3 = vadd.f32 2.0, %v3060_v43  ;;  %3077 = vpow2.f32 %v943_v7  ;;  %2262 = vst.msk [vmem:[%s4744_s6 + $0x74] sm:$0xf] %vm1615_vm1, %v2626_v25  ;;  %v4287_v42 = vpop.f32.mrf.mxu1 }
 0x161   :  { %v3062_v46 = vpop.eup %3061  ;;  %v1213_v10 = vadd.f32 2.0, %v4253_v34  ;;  %v2569_v55 = vpack.c.bf16 %v1331_v22, %v1331_v22  ;;  %v4270_v41 = vadd.f32 %v3898_v11, %v699_v61  ;;  %v697_v4 = vmul.f32 %v3879_v12, %v4172_v23 }
 0x162   :  { %v3064_v49 = vpop.eup %3063  ;;  %v1334_v19 = vmul.f32 %v3062_v46, %v1142_v21  ;;  %3079 = vrcp.f32 %v1208_v6  ;;  %v4274_v38 = vmul.f32 %v3060_v43, %v1019_v3  ;;  %v2631_v58 = vpack.c.bf16 %v3761_v26, %v3761_v26  ;;  %v4327_v46 = vpop.f32.mrf.mxu1 }
 0x163   :  { %v1332_v32 = vmul.f32 %v3064_v49, %v1140_v28  ;;  %3081 = vrcp.f32 %v1213_v10  ;;  %1652 = vst.msk [vmem:[%s4745_s5 + $0x90] sm:$0xf] %vm1615_vm1, %v2569_v55  ;;  %v834_v21 = vmin.f32 %v4270_v41, 20.0  ;;  %v702_v14 = vmul.f32 %v3879_v12, %v4210_v40 }
 0x164   :  { %v2572_v15 = vpack.c.bf16 %v1334_v19, %v1334_v19  ;;  %v1146_v28 = vmul.f32 %v1082_v1, %v4080_v20  ;;  %v1211_v23 = vadd.f32 2.0, %v4274_v38  ;;  %v4292_v18 = vadd.f32 %v3898_v11, %v697_v4  ;;  %2267 = vst.msk [vmem:[%s4744_s6 + $0x88] sm:$0xf] %vm1615_vm1, %v2631_v58  ;;  %v4309_v1 = vpop.f32.mrf.mxu0 }
 0x165   :  { %v2570_v51 = vpack.c.bf16 %v1332_v32, %v1332_v32  ;;  %v949_v8 = vmul.f32 1.442695, %v834_v21  ;;  %v4303_v26 = vadd.f32 %v3898_v11, %v702_v14  ;;  %v2629_v20 = vpack.c.bf16 %v3791_v0, %v3791_v0 }
 0x166   :  { %1655 = vst.msk [vmem:[%s4745_s5 + $0x9c] sm:$0xf] %vm1615_vm1, %v2572_v15  ;;  %v700_v40 = vmul.f32 %v3879_v12, %v4234_v47  ;;  %v3066_v7 = vpop.eup %3065  ;;  %3083 = vrcp.f32 %v1211_v23  ;;  %v832_v61 = vmin.f32 %v4292_v18, 20.0  ;;  %v2632_v25 = vpack.c.bf16 %v3811_v63, %v3811_v63  ;;  %v610_v21 = vpop.f32.mrf.mxu0 }
 0x167   :  { %1653 = vst.msk [vmem:[%s4745_s5 + $0x94] sm:$0xf] %vm1615_vm1, %v2570_v51  ;;  %v703_v43 = vmul.f32 %v3879_v12, %v2784_v56  ;;  %v3068_v0 = vpop.eup %3067  ;;  %v1022_v22 = vadd.f32 2.0, %v3066_v7  ;;  %3085 = vpow2.f32 %v949_v8  ;;  %v837_v47 = vmin.f32 %v4303_v26, 20.0  ;;  %2265 = vst.msk [vmem:[%s4744_s6 + $0x80] sm:$0xf] %vm1615_vm1, %v2629_v20 }
 0x168   :  { %v4325_v6 = vadd.f32 %v3898_v11, %v700_v40  ;;  %v1337_v3 = vmul.f32 %v3068_v0, %v1145_v60  ;;  %v945_v63 = vmul.f32 1.442695, %v832_v61  ;;  %2268 = vst.msk [vmem:[%s4744_s6 + $0x8c] sm:$0xf] %vm1615_vm1, %v2632_v25  ;;  %v2630_v49 = vpack.c.bf16 %v3833_v2, %v3833_v2  ;;  %v4348_v40 = vpop.f32.mrf.mxu1 }
 0x169   :  { %v3070_v10 = vpop.eup %3069  ;;  %v4334_v56 = vadd.f32 %v3898_v11, %v703_v43  ;;  %v1086_v19 = vmul.f32 %v3066_v7, %v1022_v22  ;;  %v955_v4 = vmul.f32 1.442695, %v837_v47  ;;  %v1144_v2 = vmul.f32 %v4247_v16, %v4109_v9  ;;  %v2788_v22 = vpop.f32.mrf.mxu0 }
 0x16a   :  { %v3072_v55 = vpop.eup %3071  ;;  %v1020_v32 = vadd.f32 2.0, %v3070_v10  ;;  %v835_v15 = vmin.f32 %v4325_v6, 20.0  ;;  %v2575_v58 = vpack.c.bf16 %v1337_v3, %v1337_v3  ;;  %3087 = vpow2.f32 %v945_v63  ;;  %2266 = vst.msk [vmem:[%s4744_s6 + $0x84] sm:$0xf] %vm1615_vm1, %v2630_v49 }
 0x16b   :  { %v3074_v60 = vpop.eup %3073  ;;  %v1335_v14 = vmul.f32 %v3072_v55, %v1143_v53  ;;  %v838_v51 = vmin.f32 %v4334_v56, 20.0  ;;  %v1214_v23 = vadd.f32 2.0, %v1086_v19  ;;  %v1149_v61 = vmul.f32 %v4253_v34, %v4116_v24  ;;  %v4367_v55 = vpop.f32.mrf.mxu1 }
 0x16c   :  { %v4346_v8 = vmul.f32 %v3070_v10, %v1020_v32  ;;  %v1025_v20 = vadd.f32 2.0, %v3074_v60  ;;  %v3076_v7 = vpop.eup %3075  ;;  %1658 = vst.msk [vmem:[%s4745_s5 + $0xa8] sm:$0xf] %vm1615_vm1, %v2575_v58  ;;  %3089 = vpow2.f32 %v955_v4  ;;  %v951_v25 = vmul.f32 1.442695, %v835_v15 }
 0x16d   :  { %v2573_v53 = vpack.c.bf16 %v1335_v14, %v1335_v14  ;;  %v3078_v43 = vpop.eup %3077  ;;  %v1338_v9 = vmul.f32 %v3076_v7, %v1146_v28  ;;  %3091 = vrcp.f32 %v1214_v23  ;;  %v957_v0 = vmul.f32 1.442695, %v838_v51 }
 0x16e   :  { %v1212_v16 = vadd.f32 2.0, %v4346_v8  ;;  %v4361_v10 = vmul.f32 %v3074_v60, %v1025_v20  ;;  %v1023_v3 = vadd.f32 2.0, %v3078_v43  ;;  %3093 = vpow2.f32 %v951_v25 }
 0x16f   :  { %v3080_v47 = vpop.eup %3079  ;;  %1656 = vst.msk [vmem:[%s4745_s5 + $0xa0] sm:$0xf] %vm1615_vm1, %v2573_v53  ;;  %v701_v24 = vmul.f32 %v3879_v12, %v4272_v54  ;;  %v2576_v28 = vpack.c.bf16 %v1338_v9, %v1338_v9  ;;  %v2635_v49 = vpack.c.bf16 %v3861_v30, %v3861_v30  ;;  %v1147_v4 = vmul.f32 %v4274_v38, %v4139_v52  ;;  %v613_v52 = vpop.f32.mrf.mxu0 }
 0x170   :  { %v3082_v34 = vpop.eup %3081  ;;  %v1336_v63 = vmul.f32 %v3080_v47, %v1144_v2  ;;  %3095 = vrcp.f32 %v1212_v16  ;;  %v1217_v15 = vadd.f32 2.0, %v4361_v10  ;;  %v4372_v60 = vmul.f32 %v3078_v43, %v1023_v3 }
 0x171   :  { %v1341_v32 = vmul.f32 %v3082_v34, %v1149_v61  ;;  %1659 = vst.msk [vmem:[%s4745_s5 + $0xac] sm:$0xf] %vm1615_vm1, %v2576_v28  ;;  %3097 = vpow2.f32 %v957_v0  ;;  %v4379_v58 = vadd.f32 %v3898_v11, %v701_v24  ;;  %2271 = vst.msk [vmem:[%s4744_s6 + $0x98] sm:$0xf] %vm1615_vm1, %v2635_v49  ;;  %v706_v30 = vmul.f32 %v3879_v12, %v4309_v1  ;;  %v2791_v16 = vpop.f32.mrf.mxu0 }
 0x172   :  { %v2574_v54 = vpack.c.bf16 %v1336_v63, %v1336_v63  ;;  %v1150_v14 = vmul.f32 %v1086_v19, %v4177_v29  ;;  %3099 = vrcp.f32 %v1217_v15  ;;  %v1215_v51 = vadd.f32 2.0, %v4372_v60  ;;  %v4400_v29 = vpop.f32.mrf.mxu1 }
 0x173   :  { %v2579_v38 = vpack.c.bf16 %v1341_v32, %v1341_v32  ;;  %v3084_v2 = vpop.eup %3083  ;;  %v836_v23 = vmin.f32 %v4379_v58, 20.0  ;;  %v4395_v20 = vadd.f32 %v3898_v11, %v706_v30  ;;  %v2633_v1 = vpack.c.bf16 %v3883_v48, %v3883_v48 }
 0x174   :  { %1657 = vst.msk [vmem:[%s4745_s5 + $0xa4] sm:$0xf] %vm1615_vm1, %v2574_v54  ;;  %v704_v7 = vmul.f32 %v3879_v12, %v610_v21  ;;  %v3086_v19 = vpop.eup %3085  ;;  %v1339_v53 = vmul.f32 %v3084_v2, %v1147_v4  ;;  %3101 = vrcp.f32 %v1215_v51  ;;  %v2636_v61 = vpack.c.bf16 %v3924_v33, %v3924_v33  ;;  %v4428_v63 = vpop.f32.mrf.mxu1 }
 0x175   :  { %1662 = vst.msk [vmem:[%s4745_s5 + $0xb8] sm:$0xf] %vm1615_vm1, %v2579_v38  ;;  %v707_v25 = vmul.f32 %v3879_v12, %v2788_v22  ;;  %v1026_v43 = vadd.f32 2.0, %v3086_v19  ;;  %v953_v9 = vmul.f32 1.442695, %v836_v23  ;;  %v841_v48 = vmin.f32 %v4395_v20, 20.0  ;;  %v626_v38 = vpop.f32.mrf.mxu0 }
 0x176   :  { %2269 = vst.msk [vmem:[%s4744_s6 + $0x90] sm:$0xf] %vm1615_vm1, %v2633_v1  ;;  %v4415_v21 = vadd.f32 %v3898_v11, %v704_v7  ;;  %v2577_v0 = vpack.c.bf16 %v1339_v53, %v1339_v53  ;;  %2272 = vst.msk [vmem:[%s4744_s6 + $0x9c] sm:$0xf] %vm1615_vm1, %v2636_v61  ;;  %v2634_v22 = vpack.c.bf16 %v3952_v27, %v3952_v27  ;;  %v4454_v53 = vpop.f32.mrf.mxu1 }
 0x177   :  { %v4422_v33 = vadd.f32 %v3898_v11, %v707_v25  ;;  %v705_v47 = vmul.f32 %v3879_v12, %v613_v52  ;;  %v3088_v3 = vpop.eup %3087  ;;  %v1090_v24 = vmul.f32 %v3086_v19, %v1026_v43  ;;  %3103 = vpow2.f32 %v953_v9 }
 0x178   :  { %v963_v34 = vmul.f32 1.442695, %v841_v48  ;;  %v839_v28 = vmin.f32 %v4415_v21, 20.0  ;;  %1660 = vst.msk [vmem:[%s4745_s5 + $0xb0] sm:$0xf] %vm1615_vm1, %v2577_v0  ;;  %v1024_v49 = vadd.f32 2.0, %v3088_v3  ;;  %v2639_v4 = vpack.c.bf16 %v3990_v13, %v3990_v13 }
 0x179   :  { %v842_v32 = vmin.f32 %v4422_v33, 20.0  ;;  %2270 = vst.msk [vmem:[%s4744_s6 + $0x94] sm:$0xf] %vm1615_vm1, %v2634_v22  ;;  %v4440_v27 = vadd.f32 %v3898_v11, %v705_v47  ;;  %v3090_v15 = vpop.eup %3089  ;;  %v1148_v54 = vmul.f32 %v4346_v8, %v4199_v39  ;;  %v1218_v30 = vadd.f32 2.0, %v1090_v24 }
 0x17a   :  { %3105 = vpow2.f32 %v963_v34  ;;  %v959_v52 = vmul.f32 1.442695, %v839_v28  ;;  %v3092_v51 = vpop.eup %3091  ;;  %v1088_v2 = vmul.f32 %v3088_v3, %v1024_v49  ;;  %v1029_v23 = vadd.f32 2.0, %v3090_v15  ;;  %2275 = vst.msk [vmem:[%s4744_s6 + $0xa8] sm:$0xf] %vm1615_vm1, %v2639_v4 }
 0x17b   :  { %v965_v1 = vmul.f32 1.442695, %v842_v32  ;;  %v840_v7 = vmin.f32 %v4440_v27, 20.0  ;;  %v3094_v13 = vpop.eup %3093  ;;  %v1342_v19 = vmul.f32 %v3092_v51, %v1150_v14  ;;  %3107 = vrcp.f32 %v1218_v30  ;;  %v4476_v32 = vpop.f32.mrf.mxu1 }
 0x17c   :  { %v710_v39 = vmul.f32 %v3879_v12, %v2791_v16  ;;  %v2637_v8 = vpack.c.bf16 %v4019_v57, %v4019_v57  ;;  %v1153_v25 = vmul.f32 %v4361_v10, %v4206_v35  ;;  %v1216_v43 = vadd.f32 2.0, %v1088_v2  ;;  %v2792_v57 = vpop.f32.mrf.mxu0 }
 0x17d   :  { %v3096_v61 = vpop.eup %3095  ;;  %v4458_v9 = vmul.f32 %v3090_v15, %v1029_v23  ;;  %v1027_v48 = vadd.f32 2.0, %v3094_v13  ;;  %v2580_v0 = vpack.c.bf16 %v1342_v19, %v1342_v19  ;;  %3109 = vpow2.f32 %v959_v52 }
 0x17e   :  { %v1340_v22 = vmul.f32 %v3096_v61, %v1148_v54  ;;  %v961_v14 = vmul.f32 1.442695, %v840_v7  ;;  %2273 = vst.msk [vmem:[%s4744_s6 + $0xa0] sm:$0xf] %vm1615_vm1, %v2637_v8  ;;  %v3098_v16 = vpop.eup %3097  ;;  %v1151_v47 = vmul.f32 %v4372_v60, %v4224_v37  ;;  %3111 = vrcp.f32 %v1216_v43  ;;  %v629_v51 = vpop.f32.mrf.mxu0 }
 0x17f   :  { %v1221_v35 = vadd.f32 2.0, %v4458_v9  ;;  %v4467_v10 = vmul.f32 %v3094_v13, %v1027_v48  ;;  %v3100_v3 = vpop.eup %3099  ;;  %1663 = vst.msk [vmem:[%s4745_s5 + $0xbc] sm:$0xf] %vm1615_vm1, %v2580_v0  ;;  %v1030_v28 = vadd.f32 2.0, %v3098_v16  ;;  %3113 = vpow2.f32 %v965_v1 }
 0x180   :  { %v2578_v34 = vpack.c.bf16 %v1340_v22, %v1340_v22  ;;  %v4474_v49 = vadd.f32 %v3898_v11, %v710_v39  ;;  %v1345_v37 = vmul.f32 %v3100_v3, %v1153_v25  ;;  %v1154_v60 = vmul.f32 %v1090_v24, %v4270_v41  ;;  %v4495_v39 = vpop.f32.mrf.mxu1 }
 0x181   :  { %3115 = vrcp.f32 %v1221_v35  ;;  %v1219_v4 = vadd.f32 2.0, %v4467_v10  ;;  %v3102_v15 = vpop.eup %3101  ;;  %v4484_v54 = vmul.f32 %v3098_v16, %v1030_v28  ;;  %v708_v52 = vmul.f32 %v3879_v12, %v626_v38 }
 0x182   :  { %1661 = vst.msk [vmem:[%s4745_s5 + $0xb4] sm:$0xf] %vm1615_vm1, %v2578_v34  ;;  %3117 = vpow2.f32 %v961_v14  ;;  %v845_v30 = vmin.f32 %v4474_v49, 20.0  ;;  %v2583_v23 = vpack.c.bf16 %v1345_v37, %v1345_v37  ;;  %v1343_v1 = vmul.f32 %v3102_v15, %v1151_v47  ;;  %v4538_v47 = vpop.f32.mrf.mxu1 }
 0x183   :  { %3119 = vrcp.f32 %v1219_v4  ;;  %v2640_v41 = vpack.c.bf16 %v4047_v45, %v4047_v45  ;;  %v1152_v24 = vmul.f32 %v1088_v2, %v4292_v18  ;;  %v1222_v7 = vadd.f32 2.0, %v4484_v54  ;;  %v3151_v2 = vld [vmem:[%s4742_s2] ss:$0 sm:$0xff] }
 0x184   :  { %v971_v13 = vmul.f32 1.442695, %v845_v30  ;;  %v4493_v19 = vadd.f32 %v3898_v11, %v708_v52  ;;  %v3104_v8 = vpop.eup %3103  ;;  %1666 = vst.msk [vmem:[%s4745_s5 + $0xc8] sm:$0xf] %vm1615_vm1, %v2583_v23  ;;  %v2581_v38 = vpack.c.bf16 %v1343_v1, %v1343_v1  ;;  %v711_v45 = vmul.f32 %v3879_v12, %v2792_v57 }
 0x185   :  { %2276 = vst.msk [vmem:[%s4744_s6 + $0xac] sm:$0xf] %vm1615_vm1, %v2640_v41  ;;  %v2638_v18 = vpack.c.bf16 %v4084_v44, %v4084_v44  ;;  %v709_v61 = vmul.f32 %v3151_v2, %v629_v51  ;;  %3121 = vrcp.f32 %v1222_v7  ;;  %v1028_v25 = vadd.f32 2.0, %v3104_v8  ;;  %v4572_v51 = vpop.f32.mrf.mxu1 }
 0x186   :  { %v843_v43 = vmin.f32 %v4493_v19, 20.0  ;;  %v2643_v48 = vpack.c.bf16 %v4120_v5, %v4120_v5  ;;  %1664 = vst.msk [vmem:[%s4745_s5 + $0xc0] sm:$0xf] %vm1615_vm1, %v2581_v38  ;;  %3123 = vpow2.f32 %v971_v13  ;;  %v4519_v12 = vadd.f32 %v3898_v11, %v711_v45 }
 0x187   :  { %v3106_v0 = vpop.eup %3105  ;;  %2274 = vst.msk [vmem:[%s4744_s6 + $0xa4] sm:$0xf] %vm1615_vm1, %v2638_v18  ;;  %v4526_v44 = vadd.f32 %v3898_v11, %v709_v61  ;;  %v2641_v5 = vpack.c.bf16 %v4136_v50, %v4136_v50  ;;  %v4530_v22 = vmul.f32 %v3104_v8, %v1028_v25  ;;  %v2644_v16 = vpack.c.bf16 %v4158_v17, %v4158_v17  ;;  %v2858_v61 = vpop.f32.mrf.mxu1 }
 0x188   :  { %v1033_v14 = vadd.f32 2.0, %v3106_v0  ;;  %v967_v57 = vmul.f32 1.442695, %v843_v43  ;;  %2279 = vst.msk [vmem:[%s4744_s6 + $0xb8] sm:$0xf] %vm1615_vm1, %v2643_v48  ;;  %v3108_v35 = vpop.eup %3107  ;;  %v846_v11 = vmin.f32 %v4519_v12, 20.0  ;;  %v2642_v50 = vpack.c.bf16 %v4193_v62, %v4193_v62 }
 0x189   :  { %v844_v3 = vmin.f32 %v4526_v44, 20.0  ;;  %2277 = vst.msk [vmem:[%s4744_s6 + $0xb0] sm:$0xf] %vm1615_vm1, %v2641_v5  ;;  %v2647_v34 = vpack.c.bf16 %v4221_v31, %v4221_v31  ;;  %v1346_v28 = vmul.f32 %v3108_v35, %v1154_v60  ;;  %v1157_v17 = vmul.f32 %v4458_v9, %v4303_v26  ;;  %2280 = vst.msk [vmem:[%s4744_s6 + $0xbc] sm:$0xf] %vm1615_vm1, %v2644_v16 }
 0x18a   :  { %v1220_v37 = vadd.f32 2.0, %v4530_v22  ;;  %v4553_v4 = vmul.f32 %v3106_v0, %v1033_v14  ;;  %v3110_v15 = vpop.eup %3109  ;;  %3125 = vpow2.f32 %v967_v57  ;;  %v973_v30 = vmul.f32 1.442695, %v846_v11  ;;  %2278 = vst.msk [vmem:[%s4744_s6 + $0xb4] sm:$0xf] %vm1615_vm1, %v2642_v50 }
 0x18b   :  { %v969_v62 = vmul.f32 1.442695, %v844_v3  ;;  %2283 = vst.msk [vmem:[%s4744_s6 + $0xc8] sm:$0xf] %vm1615_vm1, %v2647_v34  ;;  %v2645_v31 = vpack.c.bf16 %v4238_v59, %v4238_v59  ;;  %v3112_v26 = vpop.eup %3111  ;;  %v2584_v9 = vpack.c.bf16 %v1346_v28, %v1346_v28  ;;  %v1155_v60 = vmul.f32 %v4467_v10, %v4325_v6 }
 0x18c   :  { %3127 = vrcp.f32 %v1220_v37  ;;  %v1225_v52 = vadd.f32 2.0, %v4553_v4  ;;  %v3114_v23 = vpop.eup %3113  ;;  %v1344_v1 = vmul.f32 %v3112_v26, %v1152_v24  ;;  %v1031_v41 = vadd.f32 2.0, %v3110_v15 }
 0x18d   :  { %3129 = vpow2.f32 %v973_v30  ;;  %2281 = vst.msk [vmem:[%s4744_s6 + $0xc0] sm:$0xf] %vm1615_vm1, %v2645_v31  ;;  %v2648_v59 = vpack.c.bf16 %v4261_v36, %v4261_v36  ;;  %1667 = vst.msk [vmem:[%s4745_s5 + $0xcc] sm:$0xf] %vm1615_vm1, %v2584_v9  ;;  %v1034_v6 = vadd.f32 2.0, %v3114_v23  ;;  %v2646_v10 = vpack.c.bf16 %v4287_v42, %v4287_v42 }
 0x18e   :  { %v3116_v7 = vpop.eup %3115  ;;  %3131 = vrcp.f32 %v1225_v52  ;;  %v2651_v24 = vpack.c.bf16 %v4327_v46, %v4327_v46  ;;  %v2582_v8 = vpack.c.bf16 %v1344_v1, %v1344_v1  ;;  %v4588_v45 = vmul.f32 %v3110_v15, %v1031_v41 }
 0x18f   :  { %v3118_v13 = vpop.eup %3117  ;;  %v1349_v38 = vmul.f32 %v3116_v7, %v1157_v17  ;;  %3133 = vpow2.f32 %v969_v62  ;;  %2284 = vst.msk [vmem:[%s4744_s6 + $0xcc] sm:$0xf] %vm1615_vm1, %v2648_v59  ;;  %v4594_v18 = vmul.f32 %v3114_v23, %v1034_v6  ;;  %2282 = vst.msk [vmem:[%s4744_s6 + $0xc4] sm:$0xf] %vm1615_vm1, %v2646_v10  ;;  %v2649_v42 = vpack.c.bf16 %v4348_v40, %v4348_v40 }
 0x190   :  { %v3120_v36 = vpop.eup %3119  ;;  %v1032_v2 = vadd.f32 2.0, %v3118_v13  ;;  %2287 = vst.msk [vmem:[%s4744_s6 + $0xd8] sm:$0xf] %vm1615_vm1, %v2651_v24  ;;  %v2652_v46 = vpack.c.bf16 %v4367_v55, %v4367_v55  ;;  %1665 = vst.msk [vmem:[%s4745_s5 + $0xc4] sm:$0xf] %vm1615_vm1, %v2582_v8  ;;  %v1223_v48 = vadd.f32 2.0, %v4588_v45  ;;  %v1158_v0 = vmul.f32 %v4484_v54, %v4334_v56 }
 0x191   :  { %v2587_v25 = vpack.c.bf16 %v1349_v38, %v1349_v38  ;;  %v1347_v43 = vmul.f32 %v3120_v36, %v1155_v60  ;;  %v1226_v5 = vadd.f32 2.0, %v4594_v18  ;;  %2285 = vst.msk [vmem:[%s4744_s6 + $0xd0] sm:$0xf] %vm1615_vm1, %v2649_v42  ;;  %v2650_v40 = vpack.c.bf16 %v4400_v29, %v4400_v29  ;;  %v1965_v29 = vpop.f32.mrf.mxu1 }
 0x192   :  { %v4616_v14 = vmul.f32 %v3118_v13, %v1032_v2  ;;  %2288 = vst.msk [vmem:[%s4744_s6 + $0xdc] sm:$0xf] %vm1615_vm1, %v2652_v46  ;;  %v3122_v55 = vpop.eup %3121  ;;  %3135 = vrcp.f32 %v1223_v48  ;;  %v2655_v54 = vpack.c.bf16 %v4428_v63, %v4428_v63  ;;  %v2653_v57 = vpack.c.bf16 %v4454_v53, %v4454_v53 }
 0x193   :  { %1670 = vst.msk [vmem:[%s4745_s5 + $0xd8] sm:$0xf] %vm1615_vm1, %v2587_v25  ;;  %v2585_v56 = vpack.c.bf16 %v1347_v43, %v1347_v43  ;;  %v3124_v16 = vpop.eup %3123  ;;  %v1350_v35 = vmul.f32 %v3122_v55, %v1158_v0  ;;  %3137 = vrcp.f32 %v1226_v5  ;;  %2286 = vst.msk [vmem:[%s4744_s6 + $0xd4] sm:$0xf] %vm1615_vm1, %v2650_v40  ;;  %v2656_v53 = vpack.c.bf16 %v4476_v32, %v4476_v32 }
 0x194   :  { %v1224_v11 = vadd.f32 2.0, %v4616_v14  ;;  %v1037_v63 = vadd.f32 2.0, %v3124_v16  ;;  %2291 = vst.msk [vmem:[%s4744_s6 + $0xe8] sm:$0xf] %vm1615_vm1, %v2655_v54  ;;  %2289 = vst.msk [vmem:[%s4744_s6 + $0xe0] sm:$0xf] %vm1615_vm1, %v2653_v57  ;;  %v2654_v3 = vpack.c.bf16 %v4495_v39, %v4495_v39  ;;  %v2659_v50 = vpack.c.bf16 %v4538_v47, %v4538_v47 }
 0x195   :  { %1668 = vst.msk [vmem:[%s4745_s5 + $0xd0] sm:$0xf] %vm1615_vm1, %v2585_v56  ;;  %v2588_v34 = vpack.c.bf16 %v1350_v35, %v1350_v35  ;;  %v2657_v28 = vpack.c.bf16 %v4572_v51, %v4572_v51  ;;  %v2660_v17 = vpack.c.bf16 %v2858_v61, %v2858_v61  ;;  %2292 = vst.msk [vmem:[%s4744_s6 + $0xec] sm:$0xf] %vm1615_vm1, %v2656_v53 }
 0x196   :  { %3139 = vrcp.f32 %v1224_v11  ;;  %v1101_v37 = vmul.f32 %v3124_v16, %v1037_v63  ;;  %2290 = vst.msk [vmem:[%s4744_s6 + $0xe4] sm:$0xf] %vm1615_vm1, %v2654_v3  ;;  %2295 = vst.msk [vmem:[%s4744_s6 + $0xf8] sm:$0xf] %vm1615_vm1, %v2659_v50  ;;  %v2658_v32 = vpack.c.bf16 %v1965_v29, %v1965_v29  ;;  %v1156_v47 = vmul.f32 %v4530_v22, %v4379_v58 }
 0x197   :  { %v3126_v39 = vpop.eup %3125  ;;  %1671 = vst.msk [vmem:[%s4745_s5 + $0xdc] sm:$0xf] %vm1615_vm1, %v2588_v34  ;;  %2293 = vst.msk [vmem:[%s4744_s6 + $0xf0] sm:$0xf] %vm1615_vm1, %v2657_v28  ;;  %v1161_v22 = vmul.f32 %v4553_v4, %v4395_v20  ;;  %v1159_v6 = vmul.f32 %v4588_v45, %v4415_v21  ;;  %v1162_v24 = vmul.f32 %v4594_v18, %v4422_v33 }
 0x198   :  { %2296 = vst.msk [vmem:[%s4744_s6 + $0xfc] sm:$0xf] %vm1615_vm1, %v2660_v17  ;;  %v1229_v30 = vadd.f32 2.0, %v1101_v37  ;;  %v1035_v62 = vadd.f32 2.0, %v3126_v39  ;;  %2294 = vst.msk [vmem:[%s4744_s6 + $0xf4] sm:$0xf] %vm1615_vm1, %v2658_v32  ;;  %v1160_v21 = vmul.f32 %v4616_v14, %v4440_v27  ;;  %v1165_v18 = vmul.f32 %v1101_v37, %v4474_v49 }
 0x199   :  { %v3128_v15 = vpop.eup %3127 }
 0x19a   :  { %v3130_v31 = vpop.eup %3129  ;;  %v1348_v58 = vmul.f32 %v3128_v15, %v1156_v47  ;;  %3141 = vrcp.f32 %v1229_v30  ;;  %v1099_v9 = vmul.f32 %v3126_v39, %v1035_v62 }
 0x19b   :  { %v3132_v26 = vpop.eup %3131  ;;  %v1038_v60 = vadd.f32 2.0, %v3130_v31 }
 0x19c   :  { %v3134_v52 = vpop.eup %3133  ;;  %v2586_v51 = vpack.c.bf16 %v1348_v58, %v1348_v58  ;;  %v1353_v23 = vmul.f32 %v3132_v26, %v1161_v22  ;;  %v1227_v1 = vadd.f32 2.0, %v1099_v9  ;;  %v1163_v43 = vmul.f32 %v1099_v9, %v4493_v19 }
 0x19d   :  { %v1102_v41 = vmul.f32 %v3130_v31, %v1038_v60  ;;  %v1036_v59 = vadd.f32 2.0, %v3134_v52 }
 0x19e   :  { %1669 = vst.msk [vmem:[%s4745_s5 + $0xd4] sm:$0xf] %vm1615_vm1, %v2586_v51  ;;  %v2591_v7 = vpack.c.bf16 %v1353_v23, %v1353_v23  ;;  %3143 = vrcp.f32 %v1227_v1 }
 0x19f   :  { %v1230_v20 = vadd.f32 2.0, %v1102_v41  ;;  %v1100_v4 = vmul.f32 %v3134_v52, %v1036_v59  ;;  %v3136_v10 = vpop.eup %3135  ;;  %v1166_v5 = vmul.f32 %v1102_v41, %v4519_v12 }
 0x1a0   :  { %1674 = vst.msk [vmem:[%s4745_s5 + $0xe8] sm:$0xf] %vm1615_vm1, %v2591_v7  ;;  %v3138_v13 = vpop.eup %3137  ;;  %v1351_v8 = vmul.f32 %v3136_v10, %v1159_v6 }
 0x1a1   :  { %3145 = vrcp.f32 %v1230_v20  ;;  %v1228_v38 = vadd.f32 2.0, %v1100_v4  ;;  %v1354_v36 = vmul.f32 %v3138_v13, %v1162_v24  ;;  %v1164_v55 = vmul.f32 %v1100_v4, %v4526_v44 }
 0x1a2   :  { %v2589_v2 = vpack.c.bf16 %v1351_v8, %v1351_v8 }
 0x1a3   :  { %v3140_v45 = vpop.eup %3139  ;;  %3147 = vrcp.f32 %v1228_v38  ;;  %v2592_v42 = vpack.c.bf16 %v1354_v36, %v1354_v36 }
 0x1a4   :  { %v1352_v46 = vmul.f32 %v3140_v45, %v1160_v21  ;;  %1672 = vst.msk [vmem:[%s4745_s5 + $0xe0] sm:$0xf] %vm1615_vm1, %v2589_v2 }
 0x1a5   :  { %1675 = vst.msk [vmem:[%s4745_s5 + $0xec] sm:$0xf] %vm1615_vm1, %v2592_v42 }
 0x1a6   :  { %v2590_v33 = vpack.c.bf16 %v1352_v46, %v1352_v46 }
 0x1a7   :  { %v3142_v61 = vpop.eup %3141 }
 0x1a8   :  { %1673 = vst.msk [vmem:[%s4745_s5 + $0xe4] sm:$0xf] %vm1615_vm1, %v2590_v33  ;;  %v1357_v27 = vmul.f32 %v3142_v61, %v1165_v18 }
 0x1aa   :  { %v2595_v25 = vpack.c.bf16 %v1357_v27, %v1357_v27 }
 0x1ab   :  { %v3144_v48 = vpop.eup %3143 }
 0x1ac   :  { %1678 = vst.msk [vmem:[%s4745_s5 + $0xf8] sm:$0xf] %vm1615_vm1, %v2595_v25  ;;  %v1355_v0 = vmul.f32 %v3144_v48, %v1163_v43 }
 0x1ae   :  { %v3146_v49 = vpop.eup %3145  ;;  %v2593_v14 = vpack.c.bf16 %v1355_v0, %v1355_v0 }
 0x1af   :  { %v1358_v40 = vmul.f32 %v3146_v49, %v1166_v5 }
 0x1b0   :  { %v3148_v56 = vpop.eup %3147  ;;  %1676 = vst.msk [vmem:[%s4745_s5 + $0xf0] sm:$0xf] %vm1615_vm1, %v2593_v14 }
 0x1b1   :  { %v2596_v19 = vpack.c.bf16 %v1358_v40, %v1358_v40  ;;  %v1356_v54 = vmul.f32 %v3148_v56, %v1164_v55 }
 0x1b3   :  { %1679 = vst.msk [vmem:[%s4745_s5 + $0xfc] sm:$0xf] %vm1615_vm1, %v2596_v19  ;;  %v2594_v57 = vpack.c.bf16 %v1356_v54, %v1356_v54 }
 0x1b5   :  { %1677 = vst.msk [vmem:[%s4745_s5 + $0xf4] sm:$0xf] %vm1615_vm1, %v2594_v57 }

</bundles_post_ra>
